<compile_context>
chip_gen: v7x
topology: tpu7x:2x2x1
jax: 0.10.0
libtpu: 0.0.40
codegen_flags: <defaults>
</compile_context>

<pallas_src>
import jax
import jax.numpy as jnp
from jax.experimental import pallas as pl
from jax.experimental.pallas import tpu as pltpu

D_IN, D1, D2, D3 = 1024, 512, 256, 64
D3P = 128                       # fc3/out feature dim padded to a full lane width
_BN_EPS = 1e-5


def _round_up(n, m):
    return ((n + m - 1) // m) * m


def _fcnet_kernel(x_ref,
                  w1_ref, b1_ref,
                  w2_ref, b2_ref,
                  w3_ref, b3_ref,
                  w4_ref, b4_ref,
                  o_ref):
    # Cast activations to bf16 for the MXU; accumulate in f32.
    x = x_ref[...].astype(jnp.bfloat16)

    # fc1 + ReLU   (dropout = identity in eval; bn1 folded into fc2's weights)
    h1 = jnp.dot(x, w1_ref[...], preferred_element_type=jnp.float32) + b1_ref[...]
    h1 = jnp.maximum(h1, 0.0)

    # fc2 (bn1 folded in) + ReLU   (bn2 folded into fc3's weights)
    h2 = jnp.dot(h1.astype(jnp.bfloat16), w2_ref[...],
                 preferred_element_type=jnp.float32) + b2_ref[...]
    h2 = jnp.maximum(h2, 0.0)

    # fc3 (bn2 folded in, N padded 64->128) + ReLU
    # (bn3 folded into the out layer's weights)
    h3 = jnp.dot(h2.astype(jnp.bfloat16), w3_ref[...],
                 preferred_element_type=jnp.float32) + b3_ref[...]
    h3 = jnp.maximum(h3, 0.0)                       # padded lanes stay exactly 0

    # out layer (K=64 padded to 128, N=1): VPU multiply + lane reduction
    # instead of a single-column MXU pass.
    w4_row = w4_ref[...].astype(jnp.float32)        # (1, 128), padded lanes = 0
    o_ref[...] = (jnp.sum(h3 * w4_row, axis=-1, keepdims=True)
                  + b4_ref[...])


def _fold_params(params, weight_dtype=jnp.bfloat16):
    """Fold eval-mode BN (after ReLU) into the following Linear layer.

    relu_out * s + t  followed by  @ W + b   ==   relu_out @ (diag(s) W) + (t W + b)

    Returns (w1, b1, w2, b2, w3, b3, w4_row, b4) with weights pre-transposed to
    (in, out), BN folded, the 64-wide fc3/out dim zero-padded to 128, weights
    cast to `weight_dtype`, biases kept in f32.
    """
    def bn_scale_shift(i):
        g, b = params[f"bn{i}_g"], params[f"bn{i}_b"]
        m, v = params[f"bn{i}_m"], params[f"bn{i}_v"]
        s = g / jnp.sqrt(v + _BN_EPS)
        return s, b - m * s

    s1, t1 = bn_scale_shift(1)
    s2, t2 = bn_scale_shift(2)
    s3, t3 = bn_scale_shift(3)

    w1t = params["w1"].T                       # (1024, 512)
    w2t = params["w2"].T                       # (512, 256)
    w3t = params["w3"].T                       # (256, 64)
    w4t = params["w4"].T                       # (64, 1)

    w1 = w1t
    b1 = params["b1"]
    w2 = s1[:, None] * w2t
    b2 = params["b2"] + t1 @ w2t
    w3 = s2[:, None] * w3t
    b3 = params["b3"] + t2 @ w3t
    w4 = s3[:, None] * w4t
    b4 = params["b4"] + t3 @ w4t               # (1,)

    # Zero-pad the 64-wide dimension to 128 (lane-dense vregs; exact zeros).
    pad = D3P - D3
    w3p = jnp.pad(w3, ((0, 0), (0, pad)))      # (256, 128)
    b3p = jnp.pad(b3, (0, pad))                # (128,)
    w4p = jnp.pad(w4, ((0, pad), (0, 0)))      # (128, 1)
    w4_row = w4p.T                             # (1, 128)

    return (w1.astype(weight_dtype),  b1.reshape(1, -1).astype(jnp.float32),
            w2.astype(weight_dtype),  b2.reshape(1, -1).astype(jnp.float32),
            w3p.astype(weight_dtype), b3p.reshape(1, -1).astype(jnp.float32),
            w4_row.astype(weight_dtype), b4.reshape(1, 1).astype(jnp.float32))


def fcnet_forward(x, params, *, tile_b=512):
    """x: (B, 1024) float32 -> (B, 1) float32 (eval-mode forward)."""
    folded = _fold_params(params)
    w1, b1, w2, b2, w3, b3, w4r, b4 = folded

    B = x.shape[0]
    # Batch tile: multiple of 8 (f32 sublane), bounded so 2 pipeline buffers of
    # the x tile plus ~1.4 MB of bf16 weights stay far below v5e's 16 MiB /
    # v7x's 32 MiB scoped-VMEM defaults.
    tile_b = max(8, min(tile_b, _round_up(B, 8)))
    Bp = _round_up(B, tile_b)
    xp = jnp.pad(x, ((0, Bp - B), (0, 0))) if Bp != B else x
    grid = (Bp // tile_b,)

    flops = 2 * B * (D_IN * D1 + D1 * D2 + D2 * D3 + D3)
    bytes_accessed = (xp.size * xp.dtype.itemsize
                      + sum(int(a.size) * a.dtype.itemsize for a in folded)
                      + Bp * 4)
    cost = pl.CostEstimate(flops=flops, transcendentals=0,
                           bytes_accessed=bytes_accessed)

    resident = lambda i: (0, 0)   # same block every step -> weights stay in VMEM

    out = pl.pallas_call(
        _fcnet_kernel,
        out_shape=jax.ShapeDtypeStruct((Bp, 1), jnp.float32),
        grid=grid,
        in_specs=[
            pl.BlockSpec((tile_b, D_IN), lambda i: (i, 0)),   # x: tiled on batch
            pl.BlockSpec(w1.shape, resident),
            pl.BlockSpec(b1.shape, resident),
            pl.BlockSpec(w2.shape, resident),
            pl.BlockSpec(b2.shape, resident),
            pl.BlockSpec(w3.shape, resident),
            pl.BlockSpec(b3.shape, resident),
            pl.BlockSpec(w4r.shape, resident),
            pl.BlockSpec(b4.shape, resident),
        ],
        out_specs=pl.BlockSpec((tile_b, 1), lambda i: (i, 0)),
        compiler_params=pltpu.CompilerParams(
            dimension_semantics=("parallel",)),
        cost_estimate=cost,
    )(xp, *folded)

    return out[:B]


def init_params(key):
    """Deterministic synthetic parameters matching FCNetForMolCLR's shapes."""
    dims = [(512, 1024), (256, 512), (64, 256), (1, 64)]
    params = {}
    keys = jax.random.split(key, 20)
    ki = 0
    for i, (out_f, in_f) in enumerate(dims, start=1):
        bound = 1.0 / jnp.sqrt(in_f)
        params[f"w{i}"] = jax.random.uniform(
            keys[ki], (out_f, in_f), jnp.float32, -bound, bound); ki += 1
        params[f"b{i}"] = jax.random.uniform(
            keys[ki], (out_f,), jnp.float32, -bound, bound); ki += 1
    for i, n in zip((1, 2, 3), (512, 256, 64)):
        params[f"bn{i}_g"] = 1.0 + 0.1 * jax.random.normal(keys[ki], (n,), jnp.float32); ki += 1
        params[f"bn{i}_b"] = 0.1 * jax.random.normal(keys[ki], (n,), jnp.float32); ki += 1
        params[f"bn{i}_m"] = 0.05 * jax.random.normal(keys[ki], (n,), jnp.float32); ki += 1
        params[f"bn{i}_v"] = jnp.abs(
            1.0 + 0.1 * jax.random.normal(keys[ki], (n,), jnp.float32)); ki += 1
    return params


def reference_forward(x, params):
    """Plain-JAX f32 reference with the original (unfolded) module semantics."""
    def bn(h, i):
        scale = params[f"bn{i}_g"] / jnp.sqrt(params[f"bn{i}_v"] + _BN_EPS)
        return (h - params[f"bn{i}_m"]) * scale + params[f"bn{i}_b"]

    h = jnp.maximum(x @ params["w1"].T + params["b1"], 0.0)
    h = bn(h, 1)
    h = jnp.maximum(h @ params["w2"].T + params["b2"], 0.0)
    h = bn(h, 2)
    h = jnp.maximum(h @ params["w3"].T + params["b3"], 0.0)
    h = bn(h, 3)
    return h @ params["w4"].T + params["b4"]


def folded_reference(x, params):
    """Reference mirroring the kernel's exact bf16 / folded / padded arithmetic."""
    w1, b1, w2, b2, w3, b3, w4r, b4 = _fold_params(params)
    xb = x.astype(jnp.bfloat16)
    h1 = jnp.maximum(jnp.dot(xb, w1, preferred_element_type=jnp.float32) + b1, 0.0)
    h2 = jnp.maximum(jnp.dot(h1.astype(jnp.bfloat16), w2,
                             preferred_element_type=jnp.float32) + b2, 0.0)
    h3 = jnp.maximum(jnp.dot(h2.astype(jnp.bfloat16), w3,
                             preferred_element_type=jnp.float32) + b3, 0.0)
    return jnp.sum(h3 * w4r.astype(jnp.float32), axis=-1, keepdims=True) + b4


if __name__ == "__main__":
    key = jax.random.PRNGKey(0)
    kx, kp = jax.random.split(key)

    B = 8
    x = jax.random.normal(kx, (B, 1024), jnp.float32)
    params = init_params(kp)

    out = fcnet_forward(x, params)
    out = jax.block_until_ready(out)
    assert out.shape == (B, 1), out.shape

    # Tight check against a reference that uses the same bf16/folded/padded math.
    ref_folded = folded_reference(x, params)
    assert jnp.allclose(out, ref_folded, atol=1e-3, rtol=1e-3), \
        "mismatch vs folded bf16 reference"

    # Loose check against the original f32 module semantics (bf16 weights).
    ref_f32 = reference_forward(x, params)
    assert jnp.allclose(out, ref_f32, atol=5e-2, rtol=5e-2), \
        "mismatch vs f32 reference"

    print("KERNEL_OK")
</pallas_src>

<mosaic_0001>
module attributes {stable_mosaic.version = 11 : i64} {
  func.func @_fcnet_kernel(%arg0: i32, %arg1: memref<8x1024xf32, #tpu.memory_space<vmem>>, %arg2: memref<1024x512xbf16, #tpu.memory_space<vmem>>, %arg3: memref<1x512xf32, #tpu.memory_space<vmem>>, %arg4: memref<512x256xbf16, #tpu.memory_space<vmem>>, %arg5: memref<1x256xf32, #tpu.memory_space<vmem>>, %arg6: memref<256x128xbf16, #tpu.memory_space<vmem>>, %arg7: memref<1x128xf32, #tpu.memory_space<vmem>>, %arg8: memref<1x128xbf16, #tpu.memory_space<vmem>>, %arg9: memref<1x1xf32, #tpu.memory_space<vmem>>, %arg10: memref<8x1xf32, #tpu.memory_space<vmem>>) attributes {dimension_semantics = [#tpu.dimension_semantics<parallel>], iteration_bounds = array<i64: 1>, scalar_prefetch = 0 : i64, scratch_operands = 0 : i64, tpu.core_type = #tpu.core_type<tc>, window_params = [{transform_indices = @transform_0, window_bounds = array<i64: 8, 1024>}, {pipeline_mode = #tpu.pipeline_mode<synchronous>, transform_indices = @transform_1, window_bounds = array<i64: 1024, 512>}, {pipeline_mode = #tpu.pipeline_mode<synchronous>, transform_indices = @transform_2, window_bounds = array<i64: 1, 512>}, {pipeline_mode = #tpu.pipeline_mode<synchronous>, transform_indices = @transform_3, window_bounds = array<i64: 512, 256>}, {pipeline_mode = #tpu.pipeline_mode<synchronous>, transform_indices = @transform_4, window_bounds = array<i64: 1, 256>}, {pipeline_mode = #tpu.pipeline_mode<synchronous>, transform_indices = @transform_5, window_bounds = array<i64: 256, 128>}, {pipeline_mode = #tpu.pipeline_mode<synchronous>, transform_indices = @transform_6, window_bounds = array<i64: 1, 128>}, {pipeline_mode = #tpu.pipeline_mode<synchronous>, transform_indices = @transform_7, window_bounds = array<i64: 1, 128>}, {pipeline_mode = #tpu.pipeline_mode<synchronous>, transform_indices = @transform_8, window_bounds = array<i64: 1, 1>}, {transform_indices = @transform_9, window_bounds = array<i64: 8, 1>}]} {
    %c0 = arith.constant 0 : index
    %c0_0 = arith.constant 0 : index
    %0 = vector.load %arg1[%c0, %c0_0] : memref<8x1024xf32, #tpu.memory_space<vmem>>, vector<8x1024xf32>
    %1 = arith.truncf %0 : vector<8x1024xf32> to vector<8x1024xbf16>
    %c0_1 = arith.constant 0 : index
    %c0_2 = arith.constant 0 : index
    %2 = vector.load %arg2[%c0_1, %c0_2] : memref<1024x512xbf16, #tpu.memory_space<vmem>>, vector<1024x512xbf16>
    %cst = arith.constant dense<0.000000e+00> : vector<8x512xf32>
    %3 = tpu.matmul %1, %2, %cst {dimension_numbers = #tpu.dot_dimension_numbers<[1], [0], [0], [1], [0, 0, 1, 1], [], []>} : vector<8x1024xbf16>, vector<1024x512xbf16>, vector<8x512xf32> -> vector<8x512xf32>
    %c0_3 = arith.constant 0 : index
    %c0_4 = arith.constant 0 : index
    %4 = vector.load %arg3[%c0_3, %c0_4] : memref<1x512xf32, #tpu.memory_space<vmem>>, vector<1x512xf32>
    %5 = vector.broadcast %4 : vector<1x512xf32> to vector<8x512xf32>
    %6 = arith.addf %3, %5 : vector<8x512xf32>
    %cst_5 = arith.constant 0.000000e+00 : f32
    %7 = vector.broadcast %cst_5 : f32 to vector<8x512xf32>
    %8 = arith.maximumf %6, %7 : vector<8x512xf32>
    %9 = arith.truncf %8 : vector<8x512xf32> to vector<8x512xbf16>
    %c0_6 = arith.constant 0 : index
    %c0_7 = arith.constant 0 : index
    %10 = vector.load %arg4[%c0_6, %c0_7] : memref<512x256xbf16, #tpu.memory_space<vmem>>, vector<512x256xbf16>
    %cst_8 = arith.constant dense<0.000000e+00> : vector<8x256xf32>
    %11 = tpu.matmul %9, %10, %cst_8 {dimension_numbers = #tpu.dot_dimension_numbers<[1], [0], [0], [1], [0, 0, 1, 1], [], []>} : vector<8x512xbf16>, vector<512x256xbf16>, vector<8x256xf32> -> vector<8x256xf32>
    %c0_9 = arith.constant 0 : index
    %c0_10 = arith.constant 0 : index
    %12 = vector.load %arg5[%c0_9, %c0_10] : memref<1x256xf32, #tpu.memory_space<vmem>>, vector<1x256xf32>
    %13 = vector.broadcast %12 : vector<1x256xf32> to vector<8x256xf32>
    %14 = arith.addf %11, %13 : vector<8x256xf32>
    %cst_11 = arith.constant 0.000000e+00 : f32
    %15 = vector.broadcast %cst_11 : f32 to vector<8x256xf32>
    %16 = arith.maximumf %14, %15 : vector<8x256xf32>
    %17 = arith.truncf %16 : vector<8x256xf32> to vector<8x256xbf16>
    %c0_12 = arith.constant 0 : index
    %c0_13 = arith.constant 0 : index
    %18 = vector.load %arg6[%c0_12, %c0_13] : memref<256x128xbf16, #tpu.memory_space<vmem>>, vector<256x128xbf16>
    %cst_14 = arith.constant dense<0.000000e+00> : vector<8x128xf32>
    %19 = tpu.matmul %17, %18, %cst_14 {dimension_numbers = #tpu.dot_dimension_numbers<[1], [0], [0], [1], [0, 0, 1, 1], [], []>} : vector<8x256xbf16>, vector<256x128xbf16>, vector<8x128xf32> -> vector<8x128xf32>
    %c0_15 = arith.constant 0 : index
    %c0_16 = arith.constant 0 : index
    %20 = vector.load %arg7[%c0_15, %c0_16] : memref<1x128xf32, #tpu.memory_space<vmem>>, vector<1x128xf32>
    %21 = vector.broadcast %20 : vector<1x128xf32> to vector<8x128xf32>
    %22 = arith.addf %19, %21 : vector<8x128xf32>
    %cst_17 = arith.constant 0.000000e+00 : f32
    %23 = vector.broadcast %cst_17 : f32 to vector<8x128xf32>
    %24 = arith.maximumf %22, %23 : vector<8x128xf32>
    %c0_18 = arith.constant 0 : index
    %c0_19 = arith.constant 0 : index
    %25 = vector.load %arg8[%c0_18, %c0_19] : memref<1x128xbf16, #tpu.memory_space<vmem>>, vector<1x128xbf16>
    %26 = arith.extf %25 : vector<1x128xbf16> to vector<1x128xf32>
    %27 = vector.broadcast %26 : vector<1x128xf32> to vector<8x128xf32>
    %28 = arith.mulf %24, %27 : vector<8x128xf32>
    %cst_20 = arith.constant dense<0.000000e+00> : vector<8xf32>
    %29 = vector.multi_reduction <add>, %28, %cst_20 [1] : vector<8x128xf32> to vector<8xf32>
    %30 = vector.shape_cast %29 : vector<8xf32> to vector<8x1xf32>
    %c0_21 = arith.constant 0 : index
    %c0_22 = arith.constant 0 : index
    %31 = vector.load %arg9[%c0_21, %c0_22] : memref<1x1xf32, #tpu.memory_space<vmem>>, vector<1x1xf32>
    %32 = vector.broadcast %31 : vector<1x1xf32> to vector<8x1xf32>
    %33 = arith.addf %30, %32 : vector<8x1xf32>
    %c0_23 = arith.constant 0 : index
    %c0_24 = arith.constant 0 : index
    %34 = vector.load %arg10[%c0_23, %c0_24] : memref<8x1xf32, #tpu.memory_space<vmem>>, vector<8x1xf32>
    tpu.vector_store %arg10[%c0_23, %c0_24], %33 {strides = array<i32>} : memref<8x1xf32, #tpu.memory_space<vmem>>, vector<8x1xf32>,
    return
  }
  func.func @transform_0(%arg0: i32) -> (i32, i32) {
    %c0_i32 = arith.constant 0 : i32
    %c0_i32_0 = arith.constant 0 : i32
    return %arg0, %c0_i32 : i32, i32
  }
  func.func @transform_1(%arg0: i32) -> (i32, i32) {
    %c0_i32 = arith.constant 0 : i32
    %c0_i32_0 = arith.constant 0 : i32
    %c0_i32_1 = arith.constant 0 : i32
    return %c0_i32, %c0_i32_0 : i32, i32
  }
  func.func @transform_2(%arg0: i32) -> (i32, i32) {
    %c0_i32 = arith.constant 0 : i32
    %c0_i32_0 = arith.constant 0 : i32
    %c0_i32_1 = arith.constant 0 : i32
    return %c0_i32, %c0_i32_0 : i32, i32
  }
  func.func @transform_3(%arg0: i32) -> (i32, i32) {
    %c0_i32 = arith.constant 0 : i32
    %c0_i32_0 = arith.constant 0 : i32
    %c0_i32_1 = arith.constant 0 : i32
    return %c0_i32, %c0_i32_0 : i32, i32
  }
  func.func @transform_4(%arg0: i32) -> (i32, i32) {
    %c0_i32 = arith.constant 0 : i32
    %c0_i32_0 = arith.constant 0 : i32
    %c0_i32_1 = arith.constant 0 : i32
    return %c0_i32, %c0_i32_0 : i32, i32
  }
  func.func @transform_5(%arg0: i32) -> (i32, i32) {
    %c0_i32 = arith.constant 0 : i32
    %c0_i32_0 = arith.constant 0 : i32
    %c0_i32_1 = arith.constant 0 : i32
    return %c0_i32, %c0_i32_0 : i32, i32
  }
  func.func @transform_6(%arg0: i32) -> (i32, i32) {
    %c0_i32 = arith.constant 0 : i32
    %c0_i32_0 = arith.constant 0 : i32
    %c0_i32_1 = arith.constant 0 : i32
    return %c0_i32, %c0_i32_0 : i32, i32
  }
  func.func @transform_7(%arg0: i32) -> (i32, i32) {
    %c0_i32 = arith.constant 0 : i32
    %c0_i32_0 = arith.constant 0 : i32
    %c0_i32_1 = arith.constant 0 : i32
    return %c0_i32, %c0_i32_0 : i32, i32
  }
  func.func @transform_8(%arg0: i32) -> (i32, i32) {
    %c0_i32 = arith.constant 0 : i32
    %c0_i32_0 = arith.constant 0 : i32
    %c0_i32_1 = arith.constant 0 : i32
    return %c0_i32, %c0_i32_0 : i32, i32
  }
  func.func @transform_9(%arg0: i32) -> (i32, i32) {
    %c0_i32 = arith.constant 0 : i32
    %c0_i32_0 = arith.constant 0 : i32
    return %arg0, %c0_i32 : i32, i32
  }
}

</mosaic_0001>

<bundles_post_ra>
// kernel: tpu_custom_call.1
= control target key start
LH: loop header
LB: loop body
LE: loop exit
PB: predicated region body
PF: predicated region fallthrough
CT: control target
= control target key end

     0   :  { %s3853_s0 = inlined_call_operand.hbm [shape: f32[8,1024], index: 0, kind: input, shape index: {}]   ;;  %s3854_s1 = inlined_call_operand.hbm [shape: bf16[1024,512], index: 1, kind: input, shape index: {}]   ;;  %s3855_s2 = inlined_call_operand.vmem [shape: f32[1,512], index: 2, kind: input, shape index: {}]   ;;  %s3856_s3 = inlined_call_operand.hbm [shape: bf16[512,256], index: 3, kind: input, shape index: {}]   ;;  %s3857_s4 = inlined_call_operand.vmem [shape: f32[1,256], index: 4, kind: input, shape index: {}]   ;;  %s3858_s5 = inlined_call_operand.hbm [shape: bf16[256,128], index: 5, kind: input, shape index: {}]   ;;  %s3859_s6 = inlined_call_operand.vmem [shape: f32[1,128], index: 6, kind: input, shape index: {}]   ;;  %s3860_s7 = inlined_call_operand.vmem [shape: bf16[1,128], index: 7, kind: input, shape index: {}]   ;;  %s3861_s8 = inlined_call_operand.<no memory space> [shape: f32[1,1], index: 8, kind: input, shape index: {}]   ;;  %s3862_s9 = inlined_call_operand.vmem [shape: f32[8,1], index: 9, kind: output, shape index: {}]  }
   0x1   :  { %v14_v0 = vstv %s3861_s8 }
   0x2   :  { %15 = vst [vmem:[#allocation2] sm:$0x1] %v14_v0 }
   0x3   :  { %16 = vsyncpa [#allocation4], 0 }
   0x4   :  { %17 = vsyncpa [#allocation6], 0 }
   0x5   :  { %18 = vsyncpa [#allocation9], 0  ;;  %s3674_s11 = smov [#allocation5]   ;;  %s3580_s15 = scalar_lea.hbm %s3854_s1, 32768 }
   0x6   :  { %s34_s12 = sshll.u32 %s3674_s11, 4  ;;  %p3581_p0 = scmp.ne.s32.totalorder %s3854_s1, %s3580_s15  ;;  %s35_s12 = int_to_ptr.vmem [resolvable:$true] %s34_s12 }
   0x7   :  { %p3584_p1 = scmp.lt.u32.totalorder %s3580_s15, %s3854_s1 }
   0x9   :  { %p3586_p2 = pnand %p3584_p1, %p3581_p0 }
   0xb   :  { %3589 = shalt.err (!%p3586_p2)
}
   0xc   :  { %s3590_s8 = scalar_lea.vmem %s35_s12, 32768  ;;  %p3595_p4 = scmp.lt.s32.totalorder %s35_s12, %s35_s12 }
   0xd   :  { %p3591_p3 = scmp.ne.s32.totalorder %s35_s12, %s3590_s8  ;;  %p3596_p5 = scmp.lt.s32.totalorder %s3590_s8, %s3590_s8 }
   0xf   :  { %p3597_p6 = por %p3596_p5, %p3595_p4 }
  0x11   :  { %p3598_p7 = pnand %p3597_p6, %p3591_p3 }
  0x13   :  { %3601 = shalt.err (!%p3598_p7)
}
  0x14   :  { %s3675_s20 = smov 256   ;;  %s3676_s21 = smov 16  }
  0x15   :  { %40 = dma.hbm_to_vmem [thread:$0]  %s3854_s1, 32768, %s35_s12, [#allocation6], %s3675_s20, %s3675_s20, %s3676_s21  }
  0x16   :  { %s3677_s24 = smov [#allocation3]   ;;  %s3678_s26 = smov [#allocation7]  }
  0x17   :  { %s25_s25 = sshll.u32 %s3677_s24, 4  ;;  %s48_s27 = sshll.u32 %s3678_s26, 4  ;;  %s26_s25 = int_to_ptr.vmem [resolvable:$true] %s25_s25  ;;  %s49_s27 = int_to_ptr.vmem [resolvable:$true] %s48_s27 }
  0x18   :  { %s3602_s30 = scalar_lea.hbm %s3853_s0, 1024 }
  0x19   :  { %p3603_p8 = scmp.ne.s32.totalorder %s3853_s0, %s3602_s30  ;;  %p3606_p9 = scmp.lt.u32.totalorder %s3602_s30, %s3853_s0 }
  0x1b   :  { %p3608_p10 = pnand %p3606_p9, %p3603_p8 }
  0x1d   :  { %3611 = shalt.err (!%p3608_p10)
}
  0x1e   :  { %s3612_s1 = scalar_lea.vmem %s26_s25, 1024  ;;  %p3617_p12 = scmp.lt.s32.totalorder %s26_s25, %s26_s25 }
  0x1f   :  { %p3613_p11 = scmp.ne.s32.totalorder %s26_s25, %s3612_s1  ;;  %p3618_p13 = scmp.lt.s32.totalorder %s3612_s1, %s3612_s1 }
  0x21   :  { %p3619_p0 = por %p3618_p13, %p3617_p12 }
  0x23   :  { %p3620_p1 = pnand %p3619_p0, %p3613_p11 }
  0x25   :  { %3623 = shalt.err (!%p3620_p1)
}
  0x26   :  { %28 = dma.hbm_to_vmem [thread:$0]  %s3853_s0, 1024, %s26_s25, [#allocation4]  }
  0x27   :  { %s3624_s18 = scalar_lea.hbm %s3856_s3, 8192 }
  0x28   :  { %p3625_p2 = scmp.ne.s32.totalorder %s3856_s3, %s3624_s18  ;;  %p3628_p3 = scmp.lt.u32.totalorder %s3624_s18, %s3856_s3 }
  0x2a   :  { %p3630_p4 = pnand %p3628_p3, %p3625_p2 }
  0x2c   :  { %3633 = shalt.err (!%p3630_p4)
}
  0x2d   :  { %s3634_s22 = scalar_lea.vmem %s49_s27, 8192  ;;  %p3639_p6 = scmp.lt.s32.totalorder %s49_s27, %s49_s27 }
  0x2e   :  { %p3635_p5 = scmp.ne.s32.totalorder %s49_s27, %s3634_s22  ;;  %p3640_p7 = scmp.lt.s32.totalorder %s3634_s22, %s3634_s22 }
  0x30   :  { %p3641_p8 = por %p3640_p7, %p3639_p6 }
  0x32   :  { %p3642_p9 = pnand %p3641_p8, %p3635_p5 }
  0x34   :  { %3645 = shalt.err (!%p3642_p9)
}
  0x35   :  { %s3679_s0 = smov 128   ;;  %s3680_s23 = smov 8  }
  0x36   :  { %54 = dma.hbm_to_vmem [thread:$0]  %s3856_s3, 8192, %s49_s27, [#allocation6], %s3679_s0, %s3679_s0, %s3680_s23  }
  0x37   :  { %s3681_s26 = smov [#allocation8]   ;;  %s3646_s10 = scalar_lea.hbm %s3858_s5, 2048 }
  0x38   :  { %s62_s28 = sshll.u32 %s3681_s26, 4  ;;  %p3647_p10 = scmp.ne.s32.totalorder %s3858_s5, %s3646_s10  ;;  %s63_s28 = int_to_ptr.vmem [resolvable:$true] %s62_s28 }
  0x39   :  { %p3650_p11 = scmp.lt.u32.totalorder %s3646_s10, %s3858_s5 }
  0x3b   :  { %p3652_p12 = pnand %p3650_p11, %p3647_p10 }
  0x3d   :  { %3655 = shalt.err (!%p3652_p12)
}
  0x3e   :  { %s3656_s12 = scalar_lea.vmem %s63_s28, 2048  ;;  %p3661_p0 = scmp.lt.s32.totalorder %s63_s28, %s63_s28 }
  0x3f   :  { %p3657_p13 = scmp.ne.s32.totalorder %s63_s28, %s3656_s12  ;;  %p3662_p1 = scmp.lt.s32.totalorder %s3656_s12, %s3656_s12 }
  0x41   :  { %p3663_p2 = por %p3662_p1, %p3661_p0 }
  0x43   :  { %p3664_p3 = pnand %p3663_p2, %p3657_p13 }
  0x45   :  { %3667 = shalt.err (!%p3664_p3)
}
  0x46   :  { %s3682_s3 = smov 64   ;;  %s3683_s27 = smov 4  }
  0x47   :  { %68 = dma.hbm_to_vmem [thread:$0]  %s3858_s5, 2048, %s63_s28, [#allocation9], %s3682_s3, %s3682_s3, %s3683_s27  }
  0x48   :  { %3668 = dma.done.wait [#allocation4], 1024  }
  0x49   :  { %3669 = vsyncadd [#allocation4], 4294966272 }
  0x4a   :  { %3670 = dma.done.wait [#allocation6], 40960  }
  0x4b   :  { %3671 = vsyncadd [#allocation6], 4294926336 }
  0x4c   :  { %3672 = dma.done.wait [#allocation9], 2048  }
  0x4d   :  { %3673 = vsyncadd [#allocation9], 4294965248  ;;  %v3084_v1 = vld [vmem:[#allocation5 + $0x4] ss:$16 sps:$4 sm:$0xff]   ;;  %v3088_v3 = vld [vmem:[#allocation5] ss:$16 sps:$4 sm:$0xff]  }
  0x4e   :  { %v3086_v2 = vld [vmem:[#allocation5 + $0x204] ss:$16 sps:$4 sm:$0xff]   ;;  %1662 = vmatprep.subr.bf16.mxu1 %v3084_v1  ;;  %v3089_v4 = vld [vmem:[#allocation5 + $0x200] ss:$16 sps:$4 sm:$0xff]   ;;  %v89_v47 = vld [vmem:[#allocation3 + $0x8] sm:$0xff]  ;;  %vm2673_vm0 = vcmask 7168  }
  0x4f   :  { %1703 = vmatprep.subr.bf16.mxu0 %v3086_v2  ;;  %v3090_v5 = vld [vmem:[#allocation5 + $0x24] ss:$16 sps:$4 sm:$0xff]   ;;  %1663 = vmatpush1.bf16.msra.mxu1 %v3088_v3  ;;  %v3094_v7 = vld [vmem:[#allocation5 + $0x20] ss:$16 sps:$4 sm:$0xff]   ;;  %v3785_v49 = vpack.c.bf16 %v89_v47, %v89_v47  ;;  %v91_v50 = vld [vmem:[#allocation3 + $0x18] sm:$0xff] }
  0x50   :  { %1704 = vmatpush1.bf16.msra.mxu0 %v3089_v4  ;;  %v3092_v6 = vld [vmem:[#allocation5 + $0x224] ss:$16 sps:$4 sm:$0xff]   ;;  %1664 = vmatprep.subr.bf16.mxu1 %v3090_v5  ;;  %v3095_v8 = vld [vmem:[#allocation5 + $0x220] ss:$16 sps:$4 sm:$0xff]   ;;  %v3787_v53 = vpack.c.bf16 %v91_v50, %v91_v50  ;;  %v3237_v50 = vld [vmem:[#allocation5 + $0x128] ss:$16 sps:$4 sm:$0xff]  }
  0x51   :  { %1705 = vmatprep.subr.bf16.mxu0 %v3092_v6  ;;  %v3096_v9 = vld [vmem:[#allocation5 + $0x44] ss:$16 sps:$4 sm:$0xff]   ;;  %v3100_v11 = vld [vmem:[#allocation5 + $0x40] ss:$16 sps:$4 sm:$0xff]   ;;  %1694 = vmatprep.mubr.bf16.mxu1 %v3785_v49 }
  0x52   :  { %v3098_v10 = vld [vmem:[#allocation5 + $0x244] ss:$16 sps:$4 sm:$0xff]   ;;  %v3101_v12 = vld [vmem:[#allocation5 + $0x240] ss:$16 sps:$4 sm:$0xff]   ;;  %1735 = vmatprep.mubr.bf16.mxu0 %v3787_v53 }
  0x53   :  { %1665 = vmatpush1.bf16.msra.mxu1 %v3094_v7  ;;  %v3102_v13 = vld [vmem:[#allocation5 + $0x64] ss:$16 sps:$4 sm:$0xff]   ;;  %v3106_v15 = vld [vmem:[#allocation5 + $0x60] ss:$16 sps:$4 sm:$0xff]  }
  0x54   :  { %1706 = vmatpush1.bf16.msra.mxu0 %v3095_v8  ;;  %1666 = vmatprep.subr.bf16.mxu1 %v3096_v9  ;;  %v3104_v14 = vld [vmem:[#allocation5 + $0x264] ss:$16 sps:$4 sm:$0xff]   ;;  %v3107_v16 = vld [vmem:[#allocation5 + $0x260] ss:$16 sps:$4 sm:$0xff]   ;;  %v3185_v8 = vld [vmem:[#allocation5 + $0xc] ss:$16 sps:$4 sm:$0xff]  }
  0x55   :  { %1707 = vmatprep.subr.bf16.mxu0 %v3098_v10  ;;  %v3108_v17 = vld [vmem:[#allocation5 + $0x84] ss:$16 sps:$4 sm:$0xff]   ;;  %v3112_v19 = vld [vmem:[#allocation5 + $0x80] ss:$16 sps:$4 sm:$0xff]  }
  0x56   :  { %v3110_v18 = vld [vmem:[#allocation5 + $0x284] ss:$16 sps:$4 sm:$0xff]   ;;  %v3113_v20 = vld [vmem:[#allocation5 + $0x280] ss:$16 sps:$4 sm:$0xff]  }
  0x57   :  { %1667 = vmatpush1.bf16.msra.mxu1 %v3100_v11  ;;  %v3114_v21 = vld [vmem:[#allocation5 + $0xa4] ss:$16 sps:$4 sm:$0xff]   ;;  %v3118_v23 = vld [vmem:[#allocation5 + $0xa0] ss:$16 sps:$4 sm:$0xff]   ;;  %v3183_v11 = vld [vmem:[#allocation5 + $0x8] ss:$16 sps:$4 sm:$0xff]  }
  0x58   :  { %1708 = vmatpush1.bf16.msra.mxu0 %v3101_v12  ;;  %1668 = vmatprep.subr.bf16.mxu1 %v3102_v13  ;;  %v3116_v22 = vld [vmem:[#allocation5 + $0x2a4] ss:$16 sps:$4 sm:$0xff]   ;;  %v3119_v24 = vld [vmem:[#allocation5 + $0x2a0] ss:$16 sps:$4 sm:$0xff]  }
  0x59   :  { %1709 = vmatprep.subr.bf16.mxu0 %v3104_v14  ;;  %v3120_v25 = vld [vmem:[#allocation5 + $0xc4] ss:$16 sps:$4 sm:$0xff]   ;;  %v3124_v27 = vld [vmem:[#allocation5 + $0xc0] ss:$16 sps:$4 sm:$0xff]   ;;  %v3191_v14 = vld [vmem:[#allocation5 + $0x2c] ss:$16 sps:$4 sm:$0xff]  }
  0x5a   :  { %v3122_v26 = vld [vmem:[#allocation5 + $0x2c4] ss:$16 sps:$4 sm:$0xff]   ;;  %v3125_v28 = vld [vmem:[#allocation5 + $0x2c0] ss:$16 sps:$4 sm:$0xff]  }
  0x5b   :  { %1669 = vmatpush1.bf16.msra.mxu1 %v3106_v15  ;;  %v3126_v29 = vld [vmem:[#allocation5 + $0xe4] ss:$16 sps:$4 sm:$0xff]   ;;  %v3130_v31 = vld [vmem:[#allocation5 + $0xe0] ss:$16 sps:$4 sm:$0xff]  }
  0x5c   :  { %1710 = vmatpush1.bf16.msra.mxu0 %v3107_v16  ;;  %1670 = vmatprep.subr.bf16.mxu1 %v3108_v17  ;;  %v3128_v30 = vld [vmem:[#allocation5 + $0x2e4] ss:$16 sps:$4 sm:$0xff]   ;;  %v3131_v32 = vld [vmem:[#allocation5 + $0x2e0] ss:$16 sps:$4 sm:$0xff]   ;;  %v3189_v16 = vld [vmem:[#allocation5 + $0x28] ss:$16 sps:$4 sm:$0xff]  }
  0x5d   :  { %1711 = vmatprep.subr.bf16.mxu0 %v3110_v18  ;;  %v3132_v33 = vld [vmem:[#allocation5 + $0x104] ss:$16 sps:$4 sm:$0xff]   ;;  %v3136_v35 = vld [vmem:[#allocation5 + $0x100] ss:$16 sps:$4 sm:$0xff]   ;;  %v3197_v18 = vld [vmem:[#allocation5 + $0x4c] ss:$16 sps:$4 sm:$0xff]  }
  0x5e   :  { %v3134_v34 = vld [vmem:[#allocation5 + $0x304] ss:$16 sps:$4 sm:$0xff]   ;;  %v3137_v36 = vld [vmem:[#allocation5 + $0x300] ss:$16 sps:$4 sm:$0xff]  }
  0x5f   :  { %1671 = vmatpush1.bf16.msra.mxu1 %v3112_v19  ;;  %v3138_v37 = vld [vmem:[#allocation5 + $0x124] ss:$16 sps:$4 sm:$0xff]   ;;  %v3142_v39 = vld [vmem:[#allocation5 + $0x120] ss:$16 sps:$4 sm:$0xff]  }
  0x60   :  { %1712 = vmatpush1.bf16.msra.mxu0 %v3113_v20  ;;  %1672 = vmatprep.subr.bf16.mxu1 %v3114_v21  ;;  %v3140_v38 = vld [vmem:[#allocation5 + $0x324] ss:$16 sps:$4 sm:$0xff]   ;;  %v3143_v40 = vld [vmem:[#allocation5 + $0x320] ss:$16 sps:$4 sm:$0xff]   ;;  %v3195_v20 = vld [vmem:[#allocation5 + $0x48] ss:$16 sps:$4 sm:$0xff]  }
  0x61   :  { %1713 = vmatprep.subr.bf16.mxu0 %v3116_v22  ;;  %v3144_v41 = vld [vmem:[#allocation5 + $0x144] ss:$16 sps:$4 sm:$0xff]   ;;  %v3148_v43 = vld [vmem:[#allocation5 + $0x140] ss:$16 sps:$4 sm:$0xff]   ;;  %v3203_v22 = vld [vmem:[#allocation5 + $0x6c] ss:$16 sps:$4 sm:$0xff]  }
  0x62   :  { %v3146_v42 = vld [vmem:[#allocation5 + $0x344] ss:$16 sps:$4 sm:$0xff]   ;;  %v3149_v44 = vld [vmem:[#allocation5 + $0x340] ss:$16 sps:$4 sm:$0xff]  }
  0x63   :  { %1673 = vmatpush1.bf16.msra.mxu1 %v3118_v23  ;;  %v3150_v45 = vld [vmem:[#allocation5 + $0x164] ss:$16 sps:$4 sm:$0xff]   ;;  %v3154_v48 = vld [vmem:[#allocation5 + $0x160] ss:$16 sps:$4 sm:$0xff]  }
  0x64   :  { %1714 = vmatpush1.bf16.msra.mxu0 %v3119_v24  ;;  %1674 = vmatprep.subr.bf16.mxu1 %v3120_v25  ;;  %v3152_v46 = vld [vmem:[#allocation5 + $0x364] ss:$16 sps:$4 sm:$0xff]   ;;  %v3155_v51 = vld [vmem:[#allocation5 + $0x360] ss:$16 sps:$4 sm:$0xff]   ;;  %v3201_v24 = vld [vmem:[#allocation5 + $0x68] ss:$16 sps:$4 sm:$0xff]  }
  0x65   :  { %1715 = vmatprep.subr.bf16.mxu0 %v3122_v26  ;;  %v3156_v52 = vld [vmem:[#allocation5 + $0x184] ss:$16 sps:$4 sm:$0xff]   ;;  %v3160_v55 = vld [vmem:[#allocation5 + $0x180] ss:$16 sps:$4 sm:$0xff]   ;;  %v3209_v26 = vld [vmem:[#allocation5 + $0x8c] ss:$16 sps:$4 sm:$0xff]  }
  0x66   :  { %v3158_v54 = vld [vmem:[#allocation5 + $0x384] ss:$16 sps:$4 sm:$0xff]   ;;  %v3161_v56 = vld [vmem:[#allocation5 + $0x380] ss:$16 sps:$4 sm:$0xff]  }
  0x67   :  { %1675 = vmatpush1.bf16.msra.mxu1 %v3124_v27  ;;  %v3162_v57 = vld [vmem:[#allocation5 + $0x1a4] ss:$16 sps:$4 sm:$0xff]   ;;  %v3166_v59 = vld [vmem:[#allocation5 + $0x1a0] ss:$16 sps:$4 sm:$0xff]  }
  0x68   :  { %1716 = vmatpush1.bf16.msra.mxu0 %v3125_v28  ;;  %1676 = vmatprep.subr.bf16.mxu1 %v3126_v29  ;;  %v3164_v58 = vld [vmem:[#allocation5 + $0x3a4] ss:$16 sps:$4 sm:$0xff]   ;;  %v3167_v60 = vld [vmem:[#allocation5 + $0x3a0] ss:$16 sps:$4 sm:$0xff]   ;;  %v3207_v28 = vld [vmem:[#allocation5 + $0x88] ss:$16 sps:$4 sm:$0xff]  }
  0x69   :  { %1717 = vmatprep.subr.bf16.mxu0 %v3128_v30  ;;  %v3168_v61 = vld [vmem:[#allocation5 + $0x1c4] ss:$16 sps:$4 sm:$0xff]   ;;  %v3172_v63 = vld [vmem:[#allocation5 + $0x1c0] ss:$16 sps:$4 sm:$0xff]   ;;  %v3215_v30 = vld [vmem:[#allocation5 + $0xac] ss:$16 sps:$4 sm:$0xff]  }
  0x6a   :  { %v3170_v62 = vld [vmem:[#allocation5 + $0x3c4] ss:$16 sps:$4 sm:$0xff]   ;;  %v3173_v0 = vld [vmem:[#allocation5 + $0x3c0] ss:$16 sps:$4 sm:$0xff]  }
  0x6b   :  { %1677 = vmatpush1.bf16.msra.mxu1 %v3130_v31  ;;  %v3174_v1 = vld [vmem:[#allocation5 + $0x1e4] ss:$16 sps:$4 sm:$0xff]   ;;  %v3178_v3 = vld [vmem:[#allocation5 + $0x1e0] ss:$16 sps:$4 sm:$0xff]  }
  0x6c   :  { %1718 = vmatpush1.bf16.msra.mxu0 %v3131_v32  ;;  %1678 = vmatprep.subr.bf16.mxu1 %v3132_v33  ;;  %v3176_v2 = vld [vmem:[#allocation5 + $0x3e4] ss:$16 sps:$4 sm:$0xff]   ;;  %v3179_v4 = vld [vmem:[#allocation5 + $0x3e0] ss:$16 sps:$4 sm:$0xff]   ;;  %v3213_v32 = vld [vmem:[#allocation5 + $0xa8] ss:$16 sps:$4 sm:$0xff]  }
  0x6d   :  { %1719 = vmatprep.subr.bf16.mxu0 %v3134_v34  ;;  %v88_v5 = vld [vmem:[#allocation3] sm:$0xff]  ;;  %v90_v7 = vld [vmem:[#allocation3 + $0x10] sm:$0xff]  ;;  %v3221_v34 = vld [vmem:[#allocation5 + $0xcc] ss:$16 sps:$4 sm:$0xff]  }
  0x6e   :  { %v3182_v6 = vld [vmem:[#allocation5 + $0x404] ss:$16 sps:$4 sm:$0xff]   ;;  %v3791_v9 = vpack.c.bf16 %v88_v5, %v88_v5  ;;  %v3180_v10 = vld [vmem:[#allocation5 + $0x400] ss:$16 sps:$4 sm:$0xff]   ;;  %v3793_v12 = vpack.c.bf16 %v90_v7, %v90_v7  ;;  %v3269_v5 = vld [vmem:[#allocation5 + $0x1cc] ss:$16 sps:$4 sm:$0xff]  }
  0x6f   :  { %1679 = vmatpush1.bf16.msra.mxu1 %v3136_v35  ;;  %v3188_v13 = vld [vmem:[#allocation5 + $0x424] ss:$16 sps:$4 sm:$0xff]   ;;  %v3186_v15 = vld [vmem:[#allocation5 + $0x420] ss:$16 sps:$4 sm:$0xff]   ;;  %v93_v35 = vld [vmem:[#allocation3 + $0x28] sm:$0xff] }
  0x70   :  { %1720 = vmatpush1.bf16.msra.mxu0 %v3137_v36  ;;  %1680 = vmatprep.subr.bf16.mxu1 %v3138_v37  ;;  %v3194_v17 = vld [vmem:[#allocation5 + $0x444] ss:$16 sps:$4 sm:$0xff]   ;;  %v3192_v19 = vld [vmem:[#allocation5 + $0x440] ss:$16 sps:$4 sm:$0xff]   ;;  %v3798_v37 = vpack.c.bf16 %v93_v35, %v93_v35  ;;  %v3267_v7 = vld [vmem:[#allocation5 + $0x1c8] ss:$16 sps:$4 sm:$0xff]  }
  0x71   :  { %1721 = vmatprep.subr.bf16.mxu0 %v3140_v38  ;;  %v3200_v21 = vld [vmem:[#allocation5 + $0x464] ss:$16 sps:$4 sm:$0xff]   ;;  %v3198_v23 = vld [vmem:[#allocation5 + $0x460] ss:$16 sps:$4 sm:$0xff]   ;;  %v3219_v38 = vld [vmem:[#allocation5 + $0xc8] ss:$16 sps:$4 sm:$0xff]  }
  0x72   :  { %v3206_v25 = vld [vmem:[#allocation5 + $0x484] ss:$16 sps:$4 sm:$0xff]   ;;  %v3204_v27 = vld [vmem:[#allocation5 + $0x480] ss:$16 sps:$4 sm:$0xff]  }
  0x73   :  { %1681 = vmatpush1.bf16.msra.mxu1 %v3142_v39  ;;  %v3212_v29 = vld [vmem:[#allocation5 + $0x4a4] ss:$16 sps:$4 sm:$0xff]   ;;  %v3210_v31 = vld [vmem:[#allocation5 + $0x4a0] ss:$16 sps:$4 sm:$0xff]  }
  0x74   :  { %1722 = vmatpush1.bf16.msra.mxu0 %v3143_v40  ;;  %1682 = vmatprep.subr.bf16.mxu1 %v3144_v41  ;;  %v3218_v33 = vld [vmem:[#allocation5 + $0x4c4] ss:$16 sps:$4 sm:$0xff]   ;;  %v3216_v36 = vld [vmem:[#allocation5 + $0x4c0] ss:$16 sps:$4 sm:$0xff]   ;;  %v3227_v40 = vld [vmem:[#allocation5 + $0xec] ss:$16 sps:$4 sm:$0xff]  }
  0x75   :  { %1723 = vmatprep.subr.bf16.mxu0 %v3146_v42  ;;  %v3224_v39 = vld [vmem:[#allocation5 + $0x4e4] ss:$16 sps:$4 sm:$0xff]   ;;  %v3222_v41 = vld [vmem:[#allocation5 + $0x4e0] ss:$16 sps:$4 sm:$0xff]   ;;  %v3225_v42 = vld [vmem:[#allocation5 + $0xe8] ss:$16 sps:$4 sm:$0xff]  }
  0x76   :  { %v3236_v47 = vld [vmem:[#allocation5 + $0x524] ss:$16 sps:$4 sm:$0xff]   ;;  %v3300_v35 = vld [vmem:[#allocation5 + $0x680] ss:$16 sps:$4 sm:$0xff]  }
  0x77   :  { %1683 = vmatpush1.bf16.msra.mxu1 %v3148_v43  ;;  %v3230_v43 = vld [vmem:[#allocation5 + $0x504] ss:$16 sps:$4 sm:$0xff]  }
  0x78   :  { %1724 = vmatpush1.bf16.msra.mxu0 %v3149_v44  ;;  %1684 = vmatprep.subr.bf16.mxu1 %v3150_v45  ;;  %v3233_v44 = vld [vmem:[#allocation5 + $0x10c] ss:$16 sps:$4 sm:$0xff]   ;;  %v3228_v45 = vld [vmem:[#allocation5 + $0x500] ss:$16 sps:$4 sm:$0xff]  }
  0x79   :  { %1725 = vmatprep.subr.bf16.mxu0 %v3152_v46  ;;  %v3231_v46 = vld [vmem:[#allocation5 + $0x108] ss:$16 sps:$4 sm:$0xff]  }
  0x7b   :  { %1685 = vmatpush1.bf16.msra.mxu1 %v3154_v48  ;;  %v3239_v48 = vld [vmem:[#allocation5 + $0x12c] ss:$16 sps:$4 sm:$0xff]  }
  0x7c   :  { %1726 = vmatpush1.bf16.msra.mxu0 %v3155_v51  ;;  %1686 = vmatprep.subr.bf16.mxu1 %v3156_v52  ;;  %v3242_v51 = vld [vmem:[#allocation5 + $0x544] ss:$16 sps:$4 sm:$0xff]   ;;  %v3245_v52 = vld [vmem:[#allocation5 + $0x14c] ss:$16 sps:$4 sm:$0xff]  }
  0x7d   :  { %1727 = vmatprep.subr.bf16.mxu0 %v3158_v54  ;;  %v3240_v54 = vld [vmem:[#allocation5 + $0x540] ss:$16 sps:$4 sm:$0xff]  }
  0x7f   :  { %1687 = vmatpush1.bf16.msra.mxu1 %v3160_v55  ;;  %v3243_v55 = vld [vmem:[#allocation5 + $0x148] ss:$16 sps:$4 sm:$0xff]  }
  0x80   :  { %1728 = vmatpush1.bf16.msra.mxu0 %v3161_v56  ;;  %1688 = vmatprep.subr.bf16.mxu1 %v3162_v57  ;;  %v3248_v56 = vld [vmem:[#allocation5 + $0x564] ss:$16 sps:$4 sm:$0xff]   ;;  %v3251_v57 = vld [vmem:[#allocation5 + $0x16c] ss:$16 sps:$4 sm:$0xff]  }
  0x81   :  { %1729 = vmatprep.subr.bf16.mxu0 %v3164_v58  ;;  %v3246_v58 = vld [vmem:[#allocation5 + $0x560] ss:$16 sps:$4 sm:$0xff]  }
  0x83   :  { %1689 = vmatpush1.bf16.msra.mxu1 %v3166_v59  ;;  %v3249_v59 = vld [vmem:[#allocation5 + $0x168] ss:$16 sps:$4 sm:$0xff]  }
  0x84   :  { %1730 = vmatpush1.bf16.msra.mxu0 %v3167_v60  ;;  %1690 = vmatprep.subr.bf16.mxu1 %v3168_v61  ;;  %v3254_v60 = vld [vmem:[#allocation5 + $0x584] ss:$16 sps:$4 sm:$0xff]   ;;  %v3257_v61 = vld [vmem:[#allocation5 + $0x18c] ss:$16 sps:$4 sm:$0xff]  }
  0x85   :  { %1731 = vmatprep.subr.bf16.mxu0 %v3170_v62  ;;  %v3252_v62 = vld [vmem:[#allocation5 + $0x580] ss:$16 sps:$4 sm:$0xff]  }
  0x87   :  { %1691 = vmatpush1.bf16.msra.mxu1 %v3172_v63  ;;  %v3255_v63 = vld [vmem:[#allocation5 + $0x188] ss:$16 sps:$4 sm:$0xff]  }
  0x88   :  { %1732 = vmatpush1.bf16.msra.mxu0 %v3173_v0  ;;  %1692 = vmatprep.subr.bf16.mxu1 %v3174_v1  ;;  %v3260_v0 = vld [vmem:[#allocation5 + $0x5a4] ss:$16 sps:$4 sm:$0xff]   ;;  %v3263_v1 = vld [vmem:[#allocation5 + $0x1ac] ss:$16 sps:$4 sm:$0xff]  }
  0x89   :  { %1733 = vmatprep.subr.bf16.mxu0 %v3176_v2  ;;  %v3258_v2 = vld [vmem:[#allocation5 + $0x5a0] ss:$16 sps:$4 sm:$0xff]  }
  0x8b   :  { %1693 = vmatpush1.bf16.msra.mxu1 %v3178_v3  ;;  %v3261_v3 = vld [vmem:[#allocation5 + $0x1a8] ss:$16 sps:$4 sm:$0xff]  }
  0x8c   :  { %1734 = vmatpush1.bf16.msra.mxu0 %v3179_v4  ;;  %1826 = vmatprep.subr.bf16.mxu1 %v3185_v8  ;;  %v3266_v4 = vld [vmem:[#allocation5 + $0x5c4] ss:$16 sps:$4 sm:$0xff]  }
  0x8d   :  { %1744 = vmatprep.subr.bf16.mxu0 %v3182_v6  ;;  %v3264_v6 = vld [vmem:[#allocation5 + $0x5c0] ss:$16 sps:$4 sm:$0xff]   ;;  %v3272_v8 = vld [vmem:[#allocation5 + $0x5e4] ss:$16 sps:$4 sm:$0xff]  }
  0x8e   :  { %1695 = vmatmul.mubr.bf16.vlgmr.msra.gmra.mrb[0].mxu1 %v3791_v9 }
  0x8f   :  { %1736 = vmatmul.mubr.bf16.vlgmr.msra.gmra.mrb[0].mxu0 %v3793_v12  ;;  %1827 = vmatpush1.bf16.msra.mxu1 %v3183_v11  ;;  %v3270_v11 = vld [vmem:[#allocation5 + $0x5e0] ss:$16 sps:$4 sm:$0xff]  }
  0x90   :  { %1745 = vmatpush1.bf16.msra.mxu0 %v3180_v10  ;;  %1828 = vmatprep.subr.bf16.mxu1 %v3191_v14  ;;  %v3275_v10 = vld [vmem:[#allocation5 + $0x1ec] ss:$16 sps:$4 sm:$0xff]   ;;  %v92_v14 = vld [vmem:[#allocation3 + $0x20] sm:$0xff] }
  0x91   :  { %1746 = vmatprep.subr.bf16.mxu0 %v3188_v13  ;;  %1858 = vmatprep.mubr.bf16.mxu1 %v3785_v49  ;;  %v3234_v49 = vld [vmem:[#allocation5 + $0x520] ss:$16 sps:$4 sm:$0xff]   ;;  %v3273_v13 = vld [vmem:[#allocation5 + $0x1e8] ss:$16 sps:$4 sm:$0xff]  }
  0x92   :  { %1776 = vmatprep.mubr.bf16.mxu0 %v3798_v37 }
  0x93   :  { %1829 = vmatpush1.bf16.msra.mxu1 %v3189_v16  ;;  %v3281_v16 = vld [vmem:[#allocation5 + $0x20c] ss:$16 sps:$4 sm:$0xff]  }
  0x94   :  { %1747 = vmatpush1.bf16.msra.mxu0 %v3186_v15  ;;  %1830 = vmatprep.subr.bf16.mxu1 %v3197_v18  ;;  %v3278_v15 = vld [vmem:[#allocation5 + $0x604] ss:$16 sps:$4 sm:$0xff]   ;;  %v3276_v18 = vld [vmem:[#allocation5 + $0x600] ss:$16 sps:$4 sm:$0xff]  }
  0x95   :  { %1748 = vmatprep.subr.bf16.mxu0 %v3194_v17  ;;  %v3801_v17 = vpack.c.bf16 %v92_v14, %v92_v14  ;;  %v3360_v14 = vld [vmem:[#allocation5 + $0x7c0] ss:$16 sps:$4 sm:$0xff]  }
  0x97   :  { %1831 = vmatpush1.bf16.msra.mxu1 %v3195_v20  ;;  %v3284_v20 = vld [vmem:[#allocation5 + $0x624] ss:$16 sps:$4 sm:$0xff]  }
  0x98   :  { %1749 = vmatpush1.bf16.msra.mxu0 %v3192_v19  ;;  %1832 = vmatprep.subr.bf16.mxu1 %v3203_v22  ;;  %v3279_v19 = vld [vmem:[#allocation5 + $0x208] ss:$16 sps:$4 sm:$0xff]  }
  0x99   :  { %1750 = vmatprep.subr.bf16.mxu0 %v3200_v21  ;;  %v3287_v21 = vld [vmem:[#allocation5 + $0x22c] ss:$16 sps:$4 sm:$0xff]  }
  0x9a   :  { %v95_v22 = vld [vmem:[#allocation3 + $0x38] sm:$0xff] }
  0x9b   :  { %1833 = vmatpush1.bf16.msra.mxu1 %v3201_v24  ;;  %v3285_v24 = vld [vmem:[#allocation5 + $0x228] ss:$16 sps:$4 sm:$0xff]  }
  0x9c   :  { %1751 = vmatpush1.bf16.msra.mxu0 %v3198_v23  ;;  %1834 = vmatprep.subr.bf16.mxu1 %v3209_v26  ;;  %v3282_v23 = vld [vmem:[#allocation5 + $0x620] ss:$16 sps:$4 sm:$0xff]   ;;  %v3290_v26 = vld [vmem:[#allocation5 + $0x644] ss:$16 sps:$4 sm:$0xff]  }
  0x9d   :  { %1752 = vmatprep.subr.bf16.mxu0 %v3206_v25  ;;  %v3805_v25 = vpack.c.bf16 %v95_v22, %v95_v22  ;;  %v3374_v22 = vld [vmem:[#allocation5 + $0x40c] ss:$16 sps:$4 sm:$0xff]  }
  0x9f   :  { %1835 = vmatpush1.bf16.msra.mxu1 %v3207_v28  ;;  %v3288_v28 = vld [vmem:[#allocation5 + $0x640] ss:$16 sps:$4 sm:$0xff]  }
  0xa0   :  { %1753 = vmatpush1.bf16.msra.mxu0 %v3204_v27  ;;  %1836 = vmatprep.subr.bf16.mxu1 %v3215_v30  ;;  %v3293_v27 = vld [vmem:[#allocation5 + $0x24c] ss:$16 sps:$4 sm:$0xff]   ;;  %v3296_v30 = vld [vmem:[#allocation5 + $0x664] ss:$16 sps:$4 sm:$0xff]  }
  0xa1   :  { %1754 = vmatprep.subr.bf16.mxu0 %v3212_v29  ;;  %v3291_v29 = vld [vmem:[#allocation5 + $0x248] ss:$16 sps:$4 sm:$0xff]  }
  0xa3   :  { %1837 = vmatpush1.bf16.msra.mxu1 %v3213_v32  ;;  %v3297_v32 = vld [vmem:[#allocation5 + $0x268] ss:$16 sps:$4 sm:$0xff]  }
  0xa4   :  { %1755 = vmatpush1.bf16.msra.mxu0 %v3210_v31  ;;  %1838 = vmatprep.subr.bf16.mxu1 %v3221_v34  ;;  %v3294_v31 = vld [vmem:[#allocation5 + $0x660] ss:$16 sps:$4 sm:$0xff]   ;;  %v3305_v34 = vld [vmem:[#allocation5 + $0x28c] ss:$16 sps:$4 sm:$0xff]  }
  0xa5   :  { %1756 = vmatprep.subr.bf16.mxu0 %v3218_v33  ;;  %v3302_v33 = vld [vmem:[#allocation5 + $0x684] ss:$16 sps:$4 sm:$0xff]  }
  0xa7   :  { %1839 = vmatpush1.bf16.msra.mxu1 %v3219_v38  ;;  %v3311_v38 = vld [vmem:[#allocation5 + $0x2ac] ss:$16 sps:$4 sm:$0xff]  }
  0xa8   :  { %1757 = vmatpush1.bf16.msra.mxu0 %v3216_v36  ;;  %1840 = vmatprep.subr.bf16.mxu1 %v3227_v40  ;;  %v3303_v36 = vld [vmem:[#allocation5 + $0x288] ss:$16 sps:$4 sm:$0xff]  }
  0xa9   :  { %1758 = vmatprep.subr.bf16.mxu0 %v3224_v39  ;;  %v3306_v39 = vld [vmem:[#allocation5 + $0x6a0] ss:$16 sps:$4 sm:$0xff]   ;;  %v3309_v40 = vld [vmem:[#allocation5 + $0x2a8] ss:$16 sps:$4 sm:$0xff]  }
  0xab   :  { %1841 = vmatpush1.bf16.msra.mxu1 %v3225_v42  ;;  %v3317_v42 = vld [vmem:[#allocation5 + $0x2cc] ss:$16 sps:$4 sm:$0xff]  }
  0xac   :  { %1759 = vmatpush1.bf16.msra.mxu0 %v3222_v41  ;;  %1842 = vmatprep.subr.bf16.mxu1 %v3233_v44  ;;  %v3314_v41 = vld [vmem:[#allocation5 + $0x6c4] ss:$16 sps:$4 sm:$0xff]   ;;  %v3315_v44 = vld [vmem:[#allocation5 + $0x2c8] ss:$16 sps:$4 sm:$0xff]  }
  0xad   :  { %1760 = vmatprep.subr.bf16.mxu0 %v3230_v43  ;;  %v3312_v43 = vld [vmem:[#allocation5 + $0x6c0] ss:$16 sps:$4 sm:$0xff]  }
  0xaf   :  { %1843 = vmatpush1.bf16.msra.mxu1 %v3231_v46  ;;  %v3323_v46 = vld [vmem:[#allocation5 + $0x2ec] ss:$16 sps:$4 sm:$0xff]  }
  0xb0   :  { %1761 = vmatpush1.bf16.msra.mxu0 %v3228_v45  ;;  %1844 = vmatprep.subr.bf16.mxu1 %v3239_v48  ;;  %v3320_v45 = vld [vmem:[#allocation5 + $0x6e4] ss:$16 sps:$4 sm:$0xff]   ;;  %v3321_v48 = vld [vmem:[#allocation5 + $0x2e8] ss:$16 sps:$4 sm:$0xff]  }
  0xb1   :  { %1762 = vmatprep.subr.bf16.mxu0 %v3236_v47  ;;  %v3318_v47 = vld [vmem:[#allocation5 + $0x6e0] ss:$16 sps:$4 sm:$0xff]  }
  0xb3   :  { %1845 = vmatpush1.bf16.msra.mxu1 %v3237_v50  ;;  %v3329_v50 = vld [vmem:[#allocation5 + $0x30c] ss:$16 sps:$4 sm:$0xff]  }
  0xb4   :  { %1763 = vmatpush1.bf16.msra.mxu0 %v3234_v49  ;;  %1846 = vmatprep.subr.bf16.mxu1 %v3245_v52  ;;  %v3326_v49 = vld [vmem:[#allocation5 + $0x704] ss:$16 sps:$4 sm:$0xff]   ;;  %v3327_v52 = vld [vmem:[#allocation5 + $0x308] ss:$16 sps:$4 sm:$0xff]  }
  0xb5   :  { %1764 = vmatprep.subr.bf16.mxu0 %v3242_v51  ;;  %v3324_v51 = vld [vmem:[#allocation5 + $0x700] ss:$16 sps:$4 sm:$0xff]  }
  0xb7   :  { %1847 = vmatpush1.bf16.msra.mxu1 %v3243_v55  ;;  %v3335_v55 = vld [vmem:[#allocation5 + $0x32c] ss:$16 sps:$4 sm:$0xff]  }
  0xb8   :  { %1765 = vmatpush1.bf16.msra.mxu0 %v3240_v54  ;;  %1848 = vmatprep.subr.bf16.mxu1 %v3251_v57  ;;  %v3332_v54 = vld [vmem:[#allocation5 + $0x724] ss:$16 sps:$4 sm:$0xff]   ;;  %v3333_v57 = vld [vmem:[#allocation5 + $0x328] ss:$16 sps:$4 sm:$0xff]  }
  0xb9   :  { %1766 = vmatprep.subr.bf16.mxu0 %v3248_v56  ;;  %v3330_v56 = vld [vmem:[#allocation5 + $0x720] ss:$16 sps:$4 sm:$0xff]  }
  0xbb   :  { %1849 = vmatpush1.bf16.msra.mxu1 %v3249_v59  ;;  %v3341_v59 = vld [vmem:[#allocation5 + $0x34c] ss:$16 sps:$4 sm:$0xff]  }
  0xbc   :  { %1767 = vmatpush1.bf16.msra.mxu0 %v3246_v58  ;;  %1850 = vmatprep.subr.bf16.mxu1 %v3257_v61  ;;  %v3338_v58 = vld [vmem:[#allocation5 + $0x744] ss:$16 sps:$4 sm:$0xff]   ;;  %v3339_v61 = vld [vmem:[#allocation5 + $0x348] ss:$16 sps:$4 sm:$0xff]  }
  0xbd   :  { %1768 = vmatprep.subr.bf16.mxu0 %v3254_v60  ;;  %v3336_v60 = vld [vmem:[#allocation5 + $0x740] ss:$16 sps:$4 sm:$0xff]  }
  0xbf   :  { %1851 = vmatpush1.bf16.msra.mxu1 %v3255_v63  ;;  %v3347_v63 = vld [vmem:[#allocation5 + $0x36c] ss:$16 sps:$4 sm:$0xff]  }
  0xc0   :  { %1769 = vmatpush1.bf16.msra.mxu0 %v3252_v62  ;;  %1852 = vmatprep.subr.bf16.mxu1 %v3263_v1  ;;  %v3344_v62 = vld [vmem:[#allocation5 + $0x764] ss:$16 sps:$4 sm:$0xff]   ;;  %v3345_v1 = vld [vmem:[#allocation5 + $0x368] ss:$16 sps:$4 sm:$0xff]  }
  0xc1   :  { %1770 = vmatprep.subr.bf16.mxu0 %v3260_v0  ;;  %v3342_v0 = vld [vmem:[#allocation5 + $0x760] ss:$16 sps:$4 sm:$0xff]  }
  0xc3   :  { %1853 = vmatpush1.bf16.msra.mxu1 %v3261_v3  ;;  %v3353_v3 = vld [vmem:[#allocation5 + $0x38c] ss:$16 sps:$4 sm:$0xff]  }
  0xc4   :  { %1771 = vmatpush1.bf16.msra.mxu0 %v3258_v2  ;;  %1854 = vmatprep.subr.bf16.mxu1 %v3269_v5  ;;  %v3350_v2 = vld [vmem:[#allocation5 + $0x784] ss:$16 sps:$4 sm:$0xff]   ;;  %v3351_v5 = vld [vmem:[#allocation5 + $0x388] ss:$16 sps:$4 sm:$0xff]  }
  0xc5   :  { %1772 = vmatprep.subr.bf16.mxu0 %v3266_v4  ;;  %v3348_v4 = vld [vmem:[#allocation5 + $0x780] ss:$16 sps:$4 sm:$0xff]  }
  0xc7   :  { %1855 = vmatpush1.bf16.msra.mxu1 %v3267_v7  ;;  %v3359_v7 = vld [vmem:[#allocation5 + $0x3ac] ss:$16 sps:$4 sm:$0xff]  }
  0xc8   :  { %1773 = vmatpush1.bf16.msra.mxu0 %v3264_v6  ;;  %1856 = vmatprep.subr.bf16.mxu1 %v3275_v10  ;;  %v3356_v6 = vld [vmem:[#allocation5 + $0x7a4] ss:$16 sps:$4 sm:$0xff]   ;;  %v3357_v10 = vld [vmem:[#allocation5 + $0x3a8] ss:$16 sps:$4 sm:$0xff]  }
  0xc9   :  { %1774 = vmatprep.subr.bf16.mxu0 %v3272_v8  ;;  %v3354_v8 = vld [vmem:[#allocation5 + $0x7a0] ss:$16 sps:$4 sm:$0xff]  }
  0xcb   :  { %1857 = vmatpush1.bf16.msra.mxu1 %v3273_v13  ;;  %v3365_v13 = vld [vmem:[#allocation5 + $0x3cc] ss:$16 sps:$4 sm:$0xff]  }
  0xcc   :  { %1775 = vmatpush1.bf16.msra.mxu0 %v3270_v11  ;;  %1867 = vmatprep.subr.bf16.mxu1 %v3281_v16  ;;  %v3362_v11 = vld [vmem:[#allocation5 + $0x7c4] ss:$16 sps:$4 sm:$0xff]  }
  0xcd   :  { %1785 = vmatprep.subr.bf16.mxu0 %v3278_v15  ;;  %v3363_v15 = vld [vmem:[#allocation5 + $0x3c8] ss:$16 sps:$4 sm:$0xff]   ;;  %v3368_v16 = vld [vmem:[#allocation5 + $0x7e4] ss:$16 sps:$4 sm:$0xff]  }
  0xce   :  { %1859 = vmatmul.mubr.bf16.vlgmr.msra.gmra.mrb[4].mxu1 %v3791_v9  ;;  %v3299_v9 = vld [vmem:[#allocation5 + $0x26c] ss:$16 sps:$4 sm:$0xff]  }
  0xcf   :  { %1777 = vmatmul.mubr.bf16.vlgmr.msra.gmra.mrb[0].mxu0 %v3801_v17  ;;  %1868 = vmatpush1.bf16.msra.mxu1 %v3279_v19  ;;  %v3366_v19 = vld [vmem:[#allocation5 + $0x7e0] ss:$16 sps:$4 sm:$0xff]  }
  0xd0   :  { %1786 = vmatpush1.bf16.msra.mxu0 %v3276_v18  ;;  %1869 = vmatprep.subr.bf16.mxu1 %v3287_v21  ;;  %v3371_v18 = vld [vmem:[#allocation5 + $0x3ec] ss:$16 sps:$4 sm:$0xff]   ;;  %v94_v21 = vld [vmem:[#allocation3 + $0x30] sm:$0xff] }
  0xd1   :  { %1787 = vmatprep.subr.bf16.mxu0 %v3284_v20  ;;  %1817 = vmatprep.mubr.bf16.mxu0 %v3805_v25  ;;  %v3369_v20 = vld [vmem:[#allocation5 + $0x3e8] ss:$16 sps:$4 sm:$0xff]  }
  0xd2   :  { %1899 = vmatprep.mubr.bf16.mxu1 %v3787_v53  ;;  %v3308_v53 = vld [vmem:[#allocation5 + $0x6a4] ss:$16 sps:$4 sm:$0xff]  }
  0xd3   :  { %1870 = vmatpush1.bf16.msra.mxu1 %v3285_v24  ;;  %v3809_v24 = vpack.c.bf16 %v94_v21, %v94_v21  ;;  %v3422_v21 = vld [vmem:[#allocation5 + $0x60c] ss:$16 sps:$4 sm:$0xff]  }
  0xd4   :  { %1788 = vmatpush1.bf16.msra.mxu0 %v3282_v23  ;;  %1871 = vmatprep.subr.bf16.mxu1 %v3293_v27  ;;  %v3372_v23 = vld [vmem:[#allocation5 + $0x408] ss:$16 sps:$4 sm:$0xff]  }
  0xd5   :  { %1789 = vmatprep.subr.bf16.mxu0 %v3290_v26  ;;  %v3377_v26 = vld [vmem:[#allocation5 + $0x42c] ss:$16 sps:$4 sm:$0xff]   ;;  %v3468_v27 = vld [vmem:[#allocation7] ss:$8 sps:$4 sm:$0xff]  }
  0xd7   :  { %1872 = vmatpush1.bf16.msra.mxu1 %v3291_v29  ;;  %v3375_v29 = vld [vmem:[#allocation5 + $0x428] ss:$16 sps:$4 sm:$0xff]  }
  0xd8   :  { %1790 = vmatpush1.bf16.msra.mxu0 %v3288_v28  ;;  %1873 = vmatprep.subr.bf16.mxu1 %v3299_v9  ;;  %v3470_v28 = vld [vmem:[#allocation7 + $0x4] ss:$8 sps:$4 sm:$0xff]  }
  0xd9   :  { %1791 = vmatprep.subr.bf16.mxu0 %v3296_v30  ;;  %v3473_v30 = vld [vmem:[#allocation7 + $0x14] ss:$8 sps:$4 sm:$0xff]  }
  0xda   :  { %v3380_v9 = vld [vmem:[#allocation5 + $0x44c] ss:$16 sps:$4 sm:$0xff]  }
  0xdb   :  { %1874 = vmatpush1.bf16.msra.mxu1 %v3297_v32  ;;  %v3476_v32 = vld [vmem:[#allocation7 + $0x24] ss:$8 sps:$4 sm:$0xff]  }
  0xdc   :  { %1792 = vmatpush1.bf16.msra.mxu0 %v3294_v31  ;;  %1875 = vmatprep.subr.bf16.mxu1 %v3305_v34  ;;  %v3471_v31 = vld [vmem:[#allocation7 + $0x10] ss:$8 sps:$4 sm:$0xff]   ;;  %v3383_v34 = vld [vmem:[#allocation5 + $0x46c] ss:$16 sps:$4 sm:$0xff]  }
  0xdd   :  { %1793 = vmatprep.subr.bf16.mxu0 %v3302_v33  ;;  %v3378_v33 = vld [vmem:[#allocation5 + $0x448] ss:$16 sps:$4 sm:$0xff]  }
  0xdf   :  { %1876 = vmatpush1.bf16.msra.mxu1 %v3303_v36  ;;  %v3386_v36 = vld [vmem:[#allocation5 + $0x48c] ss:$16 sps:$4 sm:$0xff]  }
  0xe0   :  { %1794 = vmatpush1.bf16.msra.mxu0 %v3300_v35  ;;  %1877 = vmatprep.subr.bf16.mxu1 %v3311_v38  ;;  %v3381_v35 = vld [vmem:[#allocation5 + $0x468] ss:$16 sps:$4 sm:$0xff]   ;;  %v3482_v38 = vld [vmem:[#allocation7 + $0x44] ss:$8 sps:$4 sm:$0xff]  }
  0xe1   :  { %1795 = vmatprep.subr.bf16.mxu0 %v3308_v53  ;;  %v3479_v53 = vld [vmem:[#allocation7 + $0x34] ss:$8 sps:$4 sm:$0xff]  }
  0xe3   :  { %1878 = vmatpush1.bf16.msra.mxu1 %v3309_v40  ;;  %v3389_v40 = vld [vmem:[#allocation5 + $0x4ac] ss:$16 sps:$4 sm:$0xff]  }
  0xe4   :  { %1796 = vmatpush1.bf16.msra.mxu0 %v3306_v39  ;;  %1879 = vmatprep.subr.bf16.mxu1 %v3317_v42  ;;  %v3384_v39 = vld [vmem:[#allocation5 + $0x488] ss:$16 sps:$4 sm:$0xff]   ;;  %v3485_v42 = vld [vmem:[#allocation7 + $0x54] ss:$8 sps:$4 sm:$0xff]  }
  0xe5   :  { %1797 = vmatprep.subr.bf16.mxu0 %v3314_v41  ;;  %v3480_v41 = vld [vmem:[#allocation7 + $0x40] ss:$8 sps:$4 sm:$0xff]  }
  0xe7   :  { %1880 = vmatpush1.bf16.msra.mxu1 %v3315_v44  ;;  %v3392_v44 = vld [vmem:[#allocation5 + $0x4cc] ss:$16 sps:$4 sm:$0xff]  }
  0xe8   :  { %1798 = vmatpush1.bf16.msra.mxu0 %v3312_v43  ;;  %1881 = vmatprep.subr.bf16.mxu1 %v3323_v46  ;;  %v3387_v43 = vld [vmem:[#allocation5 + $0x4a8] ss:$16 sps:$4 sm:$0xff]   ;;  %v3488_v46 = vld [vmem:[#allocation7 + $0x64] ss:$8 sps:$4 sm:$0xff]  }
  0xe9   :  { %1799 = vmatprep.subr.bf16.mxu0 %v3320_v45  ;;  %v3483_v45 = vld [vmem:[#allocation7 + $0x50] ss:$8 sps:$4 sm:$0xff]  }
  0xeb   :  { %1882 = vmatpush1.bf16.msra.mxu1 %v3321_v48  ;;  %v3395_v48 = vld [vmem:[#allocation5 + $0x4ec] ss:$16 sps:$4 sm:$0xff]  }
  0xec   :  { %1800 = vmatpush1.bf16.msra.mxu0 %v3318_v47  ;;  %1883 = vmatprep.subr.bf16.mxu1 %v3329_v50  ;;  %v3390_v47 = vld [vmem:[#allocation5 + $0x4c8] ss:$16 sps:$4 sm:$0xff]   ;;  %v3491_v50 = vld [vmem:[#allocation7 + $0x74] ss:$8 sps:$4 sm:$0xff]  }
  0xed   :  { %1801 = vmatprep.subr.bf16.mxu0 %v3326_v49  ;;  %v3486_v49 = vld [vmem:[#allocation7 + $0x60] ss:$8 sps:$4 sm:$0xff]  }
  0xef   :  { %1884 = vmatpush1.bf16.msra.mxu1 %v3327_v52  ;;  %v3398_v52 = vld [vmem:[#allocation5 + $0x50c] ss:$16 sps:$4 sm:$0xff]  }
  0xf0   :  { %1802 = vmatpush1.bf16.msra.mxu0 %v3324_v51  ;;  %1885 = vmatprep.subr.bf16.mxu1 %v3335_v55  ;;  %v3393_v51 = vld [vmem:[#allocation5 + $0x4e8] ss:$16 sps:$4 sm:$0xff]   ;;  %v3494_v55 = vld [vmem:[#allocation7 + $0x84] ss:$8 sps:$4 sm:$0xff]  }
  0xf1   :  { %1803 = vmatprep.subr.bf16.mxu0 %v3332_v54  ;;  %v3489_v54 = vld [vmem:[#allocation7 + $0x70] ss:$8 sps:$4 sm:$0xff]  }
  0xf3   :  { %1886 = vmatpush1.bf16.msra.mxu1 %v3333_v57  ;;  %v3401_v57 = vld [vmem:[#allocation5 + $0x52c] ss:$16 sps:$4 sm:$0xff]  }
  0xf4   :  { %1804 = vmatpush1.bf16.msra.mxu0 %v3330_v56  ;;  %1887 = vmatprep.subr.bf16.mxu1 %v3341_v59  ;;  %v3396_v56 = vld [vmem:[#allocation5 + $0x508] ss:$16 sps:$4 sm:$0xff]   ;;  %v3497_v59 = vld [vmem:[#allocation7 + $0x94] ss:$8 sps:$4 sm:$0xff]  }
  0xf5   :  { %1805 = vmatprep.subr.bf16.mxu0 %v3338_v58  ;;  %v3492_v58 = vld [vmem:[#allocation7 + $0x80] ss:$8 sps:$4 sm:$0xff]  }
  0xf7   :  { %1888 = vmatpush1.bf16.msra.mxu1 %v3339_v61  ;;  %v3404_v61 = vld [vmem:[#allocation5 + $0x54c] ss:$16 sps:$4 sm:$0xff]  }
  0xf8   :  { %1806 = vmatpush1.bf16.msra.mxu0 %v3336_v60  ;;  %1889 = vmatprep.subr.bf16.mxu1 %v3347_v63  ;;  %v3399_v60 = vld [vmem:[#allocation5 + $0x528] ss:$16 sps:$4 sm:$0xff]   ;;  %v3500_v63 = vld [vmem:[#allocation7 + $0xa4] ss:$8 sps:$4 sm:$0xff]  }
  0xf9   :  { %1807 = vmatprep.subr.bf16.mxu0 %v3344_v62  ;;  %v3495_v62 = vld [vmem:[#allocation7 + $0x90] ss:$8 sps:$4 sm:$0xff]  }
  0xfb   :  { %1890 = vmatpush1.bf16.msra.mxu1 %v3345_v1  ;;  %v3407_v1 = vld [vmem:[#allocation5 + $0x56c] ss:$16 sps:$4 sm:$0xff]  }
  0xfc   :  { %1808 = vmatpush1.bf16.msra.mxu0 %v3342_v0  ;;  %1891 = vmatprep.subr.bf16.mxu1 %v3353_v3  ;;  %v3402_v0 = vld [vmem:[#allocation5 + $0x548] ss:$16 sps:$4 sm:$0xff]   ;;  %v3503_v3 = vld [vmem:[#allocation7 + $0xb4] ss:$8 sps:$4 sm:$0xff]  }
  0xfd   :  { %1809 = vmatprep.subr.bf16.mxu0 %v3350_v2  ;;  %v3498_v2 = vld [vmem:[#allocation7 + $0xa0] ss:$8 sps:$4 sm:$0xff]  }
  0xff   :  { %1892 = vmatpush1.bf16.msra.mxu1 %v3351_v5  ;;  %v3410_v5 = vld [vmem:[#allocation5 + $0x58c] ss:$16 sps:$4 sm:$0xff]  }
 0x100   :  { %1810 = vmatpush1.bf16.msra.mxu0 %v3348_v4  ;;  %1893 = vmatprep.subr.bf16.mxu1 %v3359_v7  ;;  %v3405_v4 = vld [vmem:[#allocation5 + $0x568] ss:$16 sps:$4 sm:$0xff]   ;;  %v3506_v7 = vld [vmem:[#allocation7 + $0xc4] ss:$8 sps:$4 sm:$0xff]  }
 0x101   :  { %1811 = vmatprep.subr.bf16.mxu0 %v3356_v6  ;;  %v3501_v6 = vld [vmem:[#allocation7 + $0xb0] ss:$8 sps:$4 sm:$0xff]  }
 0x103   :  { %1894 = vmatpush1.bf16.msra.mxu1 %v3357_v10  ;;  %v3413_v10 = vld [vmem:[#allocation5 + $0x5ac] ss:$16 sps:$4 sm:$0xff]  }
 0x104   :  { %1812 = vmatpush1.bf16.msra.mxu0 %v3354_v8  ;;  %1895 = vmatprep.subr.bf16.mxu1 %v3365_v13  ;;  %v3408_v8 = vld [vmem:[#allocation5 + $0x588] ss:$16 sps:$4 sm:$0xff]   ;;  %v3509_v13 = vld [vmem:[#allocation7 + $0xd4] ss:$8 sps:$4 sm:$0xff]  }
 0x105   :  { %1813 = vmatprep.subr.bf16.mxu0 %v3362_v11  ;;  %v3504_v11 = vld [vmem:[#allocation7 + $0xc0] ss:$8 sps:$4 sm:$0xff]  }
 0x107   :  { %1896 = vmatpush1.bf16.msra.mxu1 %v3363_v15  ;;  %v3416_v15 = vld [vmem:[#allocation5 + $0x5cc] ss:$16 sps:$4 sm:$0xff]  }
 0x108   :  { %1814 = vmatpush1.bf16.msra.mxu0 %v3360_v14  ;;  %1897 = vmatprep.subr.bf16.mxu1 %v3371_v18  ;;  %v3411_v14 = vld [vmem:[#allocation5 + $0x5a8] ss:$16 sps:$4 sm:$0xff]  }
 0x109   :  { %1815 = vmatprep.subr.bf16.mxu0 %v3368_v16  ;;  %v3507_v16 = vld [vmem:[#allocation7 + $0xd0] ss:$8 sps:$4 sm:$0xff]  }
 0x10a   :  { %v3414_v18 = vld [vmem:[#allocation5 + $0x5c8] ss:$16 sps:$4 sm:$0xff]  }
 0x10b   :  { %1898 = vmatpush1.bf16.msra.mxu1 %v3369_v20  ;;  %v3417_v20 = vld [vmem:[#allocation5 + $0x5e8] ss:$16 sps:$4 sm:$0xff]  }
 0x10c   :  { %1816 = vmatpush1.bf16.msra.mxu0 %v3366_v19  ;;  %1908 = vmatprep.subr.bf16.mxu1 %v3374_v22  ;;  %v3419_v19 = vld [vmem:[#allocation5 + $0x5ec] ss:$16 sps:$4 sm:$0xff]   ;;  %v3420_v22 = vld [vmem:[#allocation5 + $0x608] ss:$16 sps:$4 sm:$0xff]  }
 0x10d   :  { %2394 = vmatprep.subr.bf16.mxu0 %v3470_v28  ;;  %v3426_v28 = vld [vmem:[#allocation5 + $0x648] ss:$16 sps:$4 sm:$0xff]  }
 0x10e   :  { %1900 = vmatmul.mubr.bf16.vlgmr.msra.gmra.mrb[4].mxu1 %v3793_v12  ;;  %v3474_v12 = vld [vmem:[#allocation7 + $0x20] ss:$8 sps:$4 sm:$0xff]  }
 0x10f   :  { %1818 = vmatmul.mubr.bf16.vlgmr.msra.gmra.mrb[0].mxu0 %v3809_v24  ;;  %1909 = vmatpush1.bf16.msra.mxu1 %v3372_v23  ;;  %v3425_v23 = vld [vmem:[#allocation5 + $0x62c] ss:$16 sps:$4 sm:$0xff]  }
 0x110   :  { %1940 = vmatprep.mubr.bf16.mxu1 %v3798_v37  ;;  %1910 = vmatprep.subr.bf16.mxu1 %v3377_v26  ;;  %v3477_v37 = vld [vmem:[#allocation7 + $0x30] ss:$8 sps:$4 sm:$0xff]  }
 0x111   :  { %2395 = vmatpush1.bf16.msra.mxu0 %v3468_v27  ;;  %v3423_v26 = vld [vmem:[#allocation5 + $0x628] ss:$16 sps:$4 sm:$0xff]   ;;  %v3428_v27 = vld [vmem:[#allocation5 + $0x64c] ss:$16 sps:$4 sm:$0xff]  }
 0x112   :  { %2396 = vmatprep.subr.bf16.mxu0 %v3473_v30  ;;  %v3429_v30 = vld [vmem:[#allocation5 + $0x668] ss:$16 sps:$4 sm:$0xff]  }
 0x113   :  { %1911 = vmatpush1.bf16.msra.mxu1 %v3375_v29  ;;  %v3431_v29 = vld [vmem:[#allocation5 + $0x66c] ss:$16 sps:$4 sm:$0xff]  }
 0x114   :  { %1912 = vmatprep.subr.bf16.mxu1 %v3380_v9  ;;  %v3434_v9 = vld [vmem:[#allocation5 + $0x68c] ss:$16 sps:$4 sm:$0xff]  }
 0x115   :  { %2397 = vmatpush1.bf16.msra.mxu0 %v3471_v31  ;;  %v3432_v31 = vld [vmem:[#allocation5 + $0x688] ss:$16 sps:$4 sm:$0xff]  }
 0x116   :  { %2398 = vmatprep.subr.bf16.mxu0 %v3476_v32  ;;  %v3437_v32 = vld [vmem:[#allocation5 + $0x6ac] ss:$16 sps:$4 sm:$0xff]  }
 0x117   :  { %1913 = vmatpush1.bf16.msra.mxu1 %v3378_v33  ;;  %v3440_v33 = vld [vmem:[#allocation5 + $0x6cc] ss:$16 sps:$4 sm:$0xff]  }
 0x118   :  { %1914 = vmatprep.subr.bf16.mxu1 %v3383_v34  ;;  %v3512_v34 = vld [vmem:[#allocation7 + $0xe4] ss:$8 sps:$4 sm:$0xff]  }
 0x119   :  { %2399 = vmatpush1.bf16.msra.mxu0 %v3474_v12  ;;  %v3510_v12 = vld [vmem:[#allocation7 + $0xe0] ss:$8 sps:$4 sm:$0xff]  }
 0x11a   :  { %2400 = vmatprep.subr.bf16.mxu0 %v3479_v53  ;;  %v3438_v53 = vld [vmem:[#allocation5 + $0x6c8] ss:$16 sps:$4 sm:$0xff]  }
 0x11b   :  { %1915 = vmatpush1.bf16.msra.mxu1 %v3381_v35 }
 0x11c   :  { %1916 = vmatprep.subr.bf16.mxu1 %v3386_v36 }
 0x11d   :  { %2401 = vmatpush1.bf16.msra.mxu0 %v3477_v37 }
 0x11e   :  { %2402 = vmatprep.subr.bf16.mxu0 %v3482_v38  ;;  %v3443_v38 = vld [vmem:[#allocation5 + $0x6ec] ss:$16 sps:$4 sm:$0xff]  }
 0x11f   :  { %1917 = vmatpush1.bf16.msra.mxu1 %v3384_v39  ;;  %v3515_v39 = vld [vmem:[#allocation7 + $0xf4] ss:$8 sps:$4 sm:$0xff]  }
 0x120   :  { %1918 = vmatprep.subr.bf16.mxu1 %v3389_v40  ;;  %v3513_v40 = vld [vmem:[#allocation7 + $0xf0] ss:$8 sps:$4 sm:$0xff]  }
 0x121   :  { %2403 = vmatpush1.bf16.msra.mxu0 %v3480_v41  ;;  %v3441_v41 = vld [vmem:[#allocation5 + $0x6e8] ss:$16 sps:$4 sm:$0xff]  }
 0x122   :  { %2404 = vmatprep.subr.bf16.mxu0 %v3485_v42  ;;  %v3446_v42 = vld [vmem:[#allocation5 + $0x70c] ss:$16 sps:$4 sm:$0xff]  }
 0x123   :  { %1919 = vmatpush1.bf16.msra.mxu1 %v3387_v43  ;;  %v3518_v43 = vld [vmem:[#allocation7 + $0x104] ss:$8 sps:$4 sm:$0xff]  }
 0x124   :  { %1920 = vmatprep.subr.bf16.mxu1 %v3392_v44  ;;  %v3444_v44 = vld [vmem:[#allocation5 + $0x708] ss:$16 sps:$4 sm:$0xff]  }
 0x125   :  { %2405 = vmatpush1.bf16.msra.mxu0 %v3483_v45  ;;  %v3449_v45 = vld [vmem:[#allocation5 + $0x72c] ss:$16 sps:$4 sm:$0xff]  }
 0x126   :  { %2406 = vmatprep.subr.bf16.mxu0 %v3488_v46  ;;  %v3447_v46 = vld [vmem:[#allocation5 + $0x728] ss:$16 sps:$4 sm:$0xff]  }
 0x127   :  { %1921 = vmatpush1.bf16.msra.mxu1 %v3390_v47  ;;  %v3452_v47 = vld [vmem:[#allocation5 + $0x74c] ss:$16 sps:$4 sm:$0xff]  }
 0x128   :  { %1922 = vmatprep.subr.bf16.mxu1 %v3395_v48  ;;  %v3450_v48 = vld [vmem:[#allocation5 + $0x748] ss:$16 sps:$4 sm:$0xff]  }
 0x129   :  { %2407 = vmatpush1.bf16.msra.mxu0 %v3486_v49  ;;  %v3455_v49 = vld [vmem:[#allocation5 + $0x76c] ss:$16 sps:$4 sm:$0xff]  }
 0x12a   :  { %2408 = vmatprep.subr.bf16.mxu0 %v3491_v50  ;;  %v3453_v50 = vld [vmem:[#allocation5 + $0x768] ss:$16 sps:$4 sm:$0xff]  }
 0x12b   :  { %1923 = vmatpush1.bf16.msra.mxu1 %v3393_v51  ;;  %v3458_v51 = vld [vmem:[#allocation5 + $0x78c] ss:$16 sps:$4 sm:$0xff]  }
 0x12c   :  { %1924 = vmatprep.subr.bf16.mxu1 %v3398_v52  ;;  %v3456_v52 = vld [vmem:[#allocation5 + $0x788] ss:$16 sps:$4 sm:$0xff]  }
 0x12d   :  { %2409 = vmatpush1.bf16.msra.mxu0 %v3489_v54  ;;  %v3461_v54 = vld [vmem:[#allocation5 + $0x7ac] ss:$16 sps:$4 sm:$0xff]  }
 0x12e   :  { %2410 = vmatprep.subr.bf16.mxu0 %v3494_v55  ;;  %v3459_v55 = vld [vmem:[#allocation5 + $0x7a8] ss:$16 sps:$4 sm:$0xff]  }
 0x12f   :  { %1925 = vmatpush1.bf16.msra.mxu1 %v3396_v56  ;;  %v3464_v56 = vld [vmem:[#allocation5 + $0x7cc] ss:$16 sps:$4 sm:$0xff]  }
 0x130   :  { %1926 = vmatprep.subr.bf16.mxu1 %v3401_v57  ;;  %v3462_v57 = vld [vmem:[#allocation5 + $0x7c8] ss:$16 sps:$4 sm:$0xff]  }
 0x131   :  { %2411 = vmatpush1.bf16.msra.mxu0 %v3492_v58  ;;  %v3467_v58 = vld [vmem:[#allocation5 + $0x7ec] ss:$16 sps:$4 sm:$0xff]  }
 0x132   :  { %2412 = vmatprep.subr.bf16.mxu0 %v3497_v59  ;;  %v3465_v59 = vld [vmem:[#allocation5 + $0x7e8] ss:$16 sps:$4 sm:$0xff]  }
 0x133   :  { %1927 = vmatpush1.bf16.msra.mxu1 %v3399_v60  ;;  %v362_v60 = vlaneseq }
 0x134   :  { %1928 = vmatprep.subr.bf16.mxu1 %v3404_v61 }
 0x135   :  { %2413 = vmatpush1.bf16.msra.mxu0 %v3495_v62  ;;  %v3817_v61 = vshrl.u32 %v362_v60, 7 }
 0x136   :  { %2414 = vmatprep.subr.bf16.mxu0 %v3500_v63  ;;  %v3825_v63 = vld [vmem:[%s3855_s2] sm:$0xf] }
 0x137   :  { %1929 = vmatpush1.bf16.msra.mxu1 %v3402_v0  ;;  %v3820_v62 = vsub.s32 0, %v3817_v61  ;;  %v368_v0 = vsub.s32 1, %v3817_v61 }
 0x138   :  { %1930 = vmatprep.subr.bf16.mxu1 %v3407_v1 }
 0x139   :  { %2415 = vmatpush1.bf16.msra.mxu0 %v3498_v2  ;;  %v365_v1 = vrot.slane %v3825_v63, %v3820_v62 }
 0x13a   :  { %2416 = vmatprep.subr.bf16.mxu0 %v3503_v3 }
 0x13b   :  { %1931 = vmatpush1.bf16.msra.mxu1 %v3405_v4 }
 0x13c   :  { %1932 = vmatprep.subr.bf16.mxu1 %v3410_v5 }
 0x13d   :  { %2417 = vmatpush1.bf16.msra.mxu0 %v3501_v6 }
 0x13e   :  { %2418 = vmatprep.subr.bf16.mxu0 %v3506_v7 }
 0x13f   :  { %1933 = vmatpush1.bf16.msra.mxu1 %v3408_v8 }
 0x140   :  { %1934 = vmatprep.subr.bf16.mxu1 %v3413_v10 }
 0x141   :  { %2419 = vmatpush1.bf16.msra.mxu0 %v3504_v11 }
 0x142   :  { %2420 = vmatprep.subr.bf16.mxu0 %v3509_v13 }
 0x143   :  { %1935 = vmatpush1.bf16.msra.mxu1 %v3411_v14 }
 0x144   :  { %1936 = vmatprep.subr.bf16.mxu1 %v3416_v15  ;;  %v3516_v15 = vld [vmem:[#allocation7 + $0x100] ss:$8 sps:$4 sm:$0xff]  }
 0x145   :  { %2421 = vmatpush1.bf16.msra.mxu0 %v3507_v16 }
 0x146   :  { %2422 = vmatprep.subr.bf16.mxu0 %v3512_v34  ;;  %v3528_v34 = vld [vmem:[#allocation7 + $0x140] ss:$8 sps:$4 sm:$0xff]  }
 0x147   :  { %1937 = vmatpush1.bf16.msra.mxu1 %v3414_v18  ;;  %v3521_v18 = vld [vmem:[#allocation7 + $0x114] ss:$8 sps:$4 sm:$0xff]  }
 0x148   :  { %1938 = vmatprep.subr.bf16.mxu1 %v3419_v19  ;;  %v3564_v19 = vld [vmem:[#allocation8 + $0x40] sm:$0xff]  }
 0x149   :  { %2423 = vmatpush1.bf16.msra.mxu0 %v3510_v12  ;;  %v3573_v12 = vld [vmem:[#allocation8 + $0x20] sm:$0xff]  }
 0x14a   :  { %2424 = vmatprep.subr.bf16.mxu0 %v3515_v39  ;;  %v3539_v39 = vld [vmem:[#allocation7 + $0x174] ss:$8 sps:$4 sm:$0xff]  }
 0x14b   :  { %1939 = vmatpush1.bf16.msra.mxu1 %v3417_v20  ;;  %v3565_v20 = vld [vmem:[#allocation8] sm:$0xff]  }
 0x14c   :  { %1949 = vmatprep.subr.bf16.mxu1 %v3422_v21  ;;  %v3566_v21 = vld [vmem:[#allocation8 + $0x48] sm:$0xff]  }
 0x14d   :  { %2425 = vmatpush1.bf16.msra.mxu0 %v3513_v40  ;;  %v3537_v40 = vld [vmem:[#allocation7 + $0x170] ss:$8 sps:$4 sm:$0xff]  }
 0x14e   :  { %1941 = vmatmul.mubr.bf16.vlgmr.msra.gmra.mrb[4].mxu1 %v3801_v17  ;;  %v3435_v17 = vld [vmem:[#allocation5 + $0x6a8] ss:$16 sps:$4 sm:$0xff]   ;;  %2435 = vmatprep.subr.bf16.mxu0 %v3518_v43  ;;  %v3545_v43 = vld [vmem:[#allocation7 + $0x194] ss:$8 sps:$4 sm:$0xff]  }
 0x14f   :  { %1950 = vmatpush1.bf16.msra.mxu1 %v3420_v22  ;;  %1981 = vmatprep.mubr.bf16.mxu1 %v3805_v25  ;;  %v3519_v22 = vld [vmem:[#allocation7 + $0x110] ss:$8 sps:$4 sm:$0xff]  }
 0x150   :  { %1951 = vmatprep.subr.bf16.mxu1 %v3425_v23  ;;  %v3524_v23 = vld [vmem:[#allocation7 + $0x124] ss:$8 sps:$4 sm:$0xff]  }
 0x153   :  { %1952 = vmatpush1.bf16.msra.mxu1 %v3423_v26  ;;  %v3567_v26 = vld [vmem:[#allocation8 + $0x8] sm:$0xff]  }
 0x154   :  { %1953 = vmatprep.subr.bf16.mxu1 %v3428_v27  ;;  %v3568_v27 = vld [vmem:[#allocation8 + $0x50] sm:$0xff]  }
 0x157   :  { %1954 = vmatpush1.bf16.msra.mxu1 %v3426_v28  ;;  %v3522_v28 = vld [vmem:[#allocation7 + $0x120] ss:$8 sps:$4 sm:$0xff]  }
 0x158   :  { %1955 = vmatprep.subr.bf16.mxu1 %v3431_v29  ;;  %v3527_v29 = vld [vmem:[#allocation7 + $0x134] ss:$8 sps:$4 sm:$0xff]  }
 0x15b   :  { %1956 = vmatpush1.bf16.msra.mxu1 %v3429_v30  ;;  %v3569_v30 = vld [vmem:[#allocation8 + $0x10] sm:$0xff]  }
 0x15c   :  { %1957 = vmatprep.subr.bf16.mxu1 %v3434_v9  ;;  %v3570_v9 = vld [vmem:[#allocation8 + $0x58] sm:$0xff]  }
 0x15f   :  { %1958 = vmatpush1.bf16.msra.mxu1 %v3432_v31  ;;  %v3525_v31 = vld [vmem:[#allocation7 + $0x130] ss:$8 sps:$4 sm:$0xff]  }
 0x160   :  { %1959 = vmatprep.subr.bf16.mxu1 %v3437_v32  ;;  %v3530_v32 = vld [vmem:[#allocation7 + $0x144] ss:$8 sps:$4 sm:$0xff]  }
 0x161   :  { %v1696_v25 = vpop.f32.mrb[0].mxu1 }
 0x162   :  { %v1698_v35 = vpop.f32.mrb[1].mxu1  ;;  %v1697_v2 = vadd.f32 %v1696_v25, %v365_v1  ;;  %v3533_v25 = vld [vmem:[#allocation7 + $0x154] ss:$8 sps:$4 sm:$0xff]  }
 0x163   :  { %v1700_v36 = vpop.f32.mrb[2].mxu1  ;;  %1960 = vmatpush1.bf16.msra.mxu1 %v3435_v17  ;;  %v3571_v17 = vld [vmem:[#allocation8 + $0x18] sm:$0xff]  }
 0x164   :  { %v1701_v37 = vpop.f32.mrb[3].mxu1  ;;  %1961 = vmatprep.subr.bf16.mxu1 %v3440_v33  ;;  %v3572_v33 = vld [vmem:[#allocation8 + $0x60] sm:$0xff]   ;;  %v3531_v36 = vld [vmem:[#allocation7 + $0x150] ss:$8 sps:$4 sm:$0xff]  }
 0x165   :  { %v3575_v37 = vld [vmem:[#allocation8 + $0x28] sm:$0xff]  }
 0x167   :  { %1962 = vmatpush1.bf16.msra.mxu1 %v3438_v53  ;;  %v3536_v53 = vld [vmem:[#allocation7 + $0x164] ss:$8 sps:$4 sm:$0xff]  }
 0x168   :  { %1963 = vmatprep.subr.bf16.mxu1 %v3443_v38  ;;  %v3534_v38 = vld [vmem:[#allocation7 + $0x160] ss:$8 sps:$4 sm:$0xff]  }
 0x16b   :  { %1964 = vmatpush1.bf16.msra.mxu1 %v3441_v41  ;;  %v3542_v41 = vld [vmem:[#allocation7 + $0x184] ss:$8 sps:$4 sm:$0xff]  }
 0x16c   :  { %1965 = vmatprep.subr.bf16.mxu1 %v3446_v42  ;;  %v3540_v42 = vld [vmem:[#allocation7 + $0x180] ss:$8 sps:$4 sm:$0xff]  }
 0x16f   :  { %1966 = vmatpush1.bf16.msra.mxu1 %v3444_v44  ;;  %v3543_v44 = vld [vmem:[#allocation7 + $0x190] ss:$8 sps:$4 sm:$0xff]  }
 0x170   :  { %1967 = vmatprep.subr.bf16.mxu1 %v3449_v45  ;;  %v3548_v45 = vld [vmem:[#allocation7 + $0x1a4] ss:$8 sps:$4 sm:$0xff]  }
 0x173   :  { %1968 = vmatpush1.bf16.msra.mxu1 %v3447_v46  ;;  %v3546_v46 = vld [vmem:[#allocation7 + $0x1a0] ss:$8 sps:$4 sm:$0xff]  }
 0x174   :  { %1969 = vmatprep.subr.bf16.mxu1 %v3452_v47  ;;  %v3551_v47 = vld [vmem:[#allocation7 + $0x1b4] ss:$8 sps:$4 sm:$0xff]  }
 0x177   :  { %1970 = vmatpush1.bf16.msra.mxu1 %v3450_v48  ;;  %v3549_v48 = vld [vmem:[#allocation7 + $0x1b0] ss:$8 sps:$4 sm:$0xff]  }
 0x178   :  { %1971 = vmatprep.subr.bf16.mxu1 %v3455_v49  ;;  %v3554_v49 = vld [vmem:[#allocation7 + $0x1c4] ss:$8 sps:$4 sm:$0xff]  }
 0x17b   :  { %1972 = vmatpush1.bf16.msra.mxu1 %v3453_v50  ;;  %v3552_v50 = vld [vmem:[#allocation7 + $0x1c0] ss:$8 sps:$4 sm:$0xff]  }
 0x17c   :  { %1973 = vmatprep.subr.bf16.mxu1 %v3458_v51  ;;  %v3557_v51 = vld [vmem:[#allocation7 + $0x1d4] ss:$8 sps:$4 sm:$0xff]  }
 0x17f   :  { %1974 = vmatpush1.bf16.msra.mxu1 %v3456_v52  ;;  %v3555_v52 = vld [vmem:[#allocation7 + $0x1d0] ss:$8 sps:$4 sm:$0xff]  }
 0x180   :  { %1975 = vmatprep.subr.bf16.mxu1 %v3461_v54  ;;  %v3560_v54 = vld [vmem:[#allocation7 + $0x1e4] ss:$8 sps:$4 sm:$0xff]  }
 0x183   :  { %1976 = vmatpush1.bf16.msra.mxu1 %v3459_v55  ;;  %v3558_v55 = vld [vmem:[#allocation7 + $0x1e0] ss:$8 sps:$4 sm:$0xff]  }
 0x184   :  { %1977 = vmatprep.subr.bf16.mxu1 %v3464_v56  ;;  %v3563_v56 = vld [vmem:[#allocation7 + $0x1f4] ss:$8 sps:$4 sm:$0xff]  }
 0x187   :  { %1978 = vmatpush1.bf16.msra.mxu1 %v3462_v57  ;;  %v3561_v57 = vld [vmem:[#allocation7 + $0x1f0] ss:$8 sps:$4 sm:$0xff]  }
 0x188   :  { %1979 = vmatprep.subr.bf16.mxu1 %v3467_v58  ;;  %v372_v58 = vsub.s32 2, %v3817_v61 }
 0x18a   :  { %v373_v60 = vrot.slane %v3825_v63, %v372_v58 }
 0x18b   :  { %1980 = vmatpush1.bf16.msra.mxu1 %v3465_v59  ;;  %v376_v59 = vsub.s32 3, %v3817_v61 }
 0x18c   :  { %3020 = vmatprep.subr.bf16.mxu1 %v3564_v19 }
 0x18d   :  { %v377_v1 = vrot.slane %v3825_v63, %v376_v59 }
 0x18e   :  { %1982 = vmatmul.mubr.bf16.vlgmr.msra.gmra.mrb[4].mxu1 %v3809_v24  ;;  %v369_v24 = vrot.slane %v3825_v63, %v368_v0  ;;  %v2062_v63 = vld [vmem:[%s3857_s4] sm:$0x3] }
 0x18f   :  { %3021 = vmatpush3.bf16.msra.mxu1 %v3565_v20  ;;  %v2071_v19 = vrot.slane %v2062_v63, %v368_v0  ;;  %v3002_v0 = vld [vmem:[%s3859_s6] ss:$0 sm:$0xff] }
 0x190   :  { %v1699_v3 = vadd.f32 %v1698_v35, %v369_v24  ;;  %3022 = vmatprep.subr.bf16.mxu1 %v3566_v21  ;;  %v3574_v35 = vld [vmem:[#allocation8 + $0x68] sm:$0xff]  }
 0x193   :  { %3023 = vmatpush3.bf16.msra.mxu1 %v3567_v26 }
 0x194   :  { %3024 = vmatprep.subr.bf16.mxu1 %v3568_v27 }
 0x197   :  { %3025 = vmatpush3.bf16.msra.mxu1 %v3569_v30 }
 0x198   :  { %3026 = vmatprep.subr.bf16.mxu1 %v3570_v9 }
 0x19b   :  { %3027 = vmatpush3.bf16.msra.mxu1 %v3571_v17 }
 0x19c   :  { %3028 = vmatprep.subr.bf16.mxu1 %v3572_v33 }
 0x19f   :  { %3029 = vmatpush3.bf16.msra.mxu1 %v3573_v12 }
 0x1a0   :  { %3030 = vmatprep.subr.bf16.mxu1 %v3574_v35 }
 0x1a3   :  { %3031 = vmatpush3.bf16.msra.mxu1 %v3575_v37  ;;  %v3019_v37 = vld [vmem:[#allocation2] ss:$0 sm:$0xff] }
 0x1e2   :  { %v1819_v4 = vpop.f32.mrb[0].mxu0 }
 0x1e3   :  { %v3043_v5 = vadd.f32 %v1819_v4, %v1697_v2  ;;  %v1821_v6 = vpop.f32.mrb[1].mxu0 }
 0x1e4   :  { %v3045_v7 = vadd.f32 %v1821_v6, %v1699_v3  ;;  %v1823_v8 = vpop.f32.mrb[2].mxu0 }
 0x1e5   :  { %v1990_v10 = vmax.f32 %v3043_v5, 0.0  ;;  %v1824_v11 = vpop.f32.mrb[3].mxu0 }
 0x1e6   :  { %v1991_v13 = vmax.f32 %v3045_v7, 0.0 }
 0x1e7   :  { %v1994_v16 = vpack.c.bf16 %v1990_v10, %v1990_v10 }
 0x1e8   :  { %v1995_v14 = vpack.c.bf16 %v1991_v13, %v1991_v13  ;;  %v3576_v13 = vld [vmem:[#allocation8 + $0x70] sm:$0xff]  }
 0x1e9   :  { %3032 = vmatprep.subr.bf16.mxu1 %v3576_v13 }
 0x1ea   :  { %2426 = vmatprep.mubr.bf16.mxu0 %v1995_v14  ;;  %v3577_v14 = vld [vmem:[#allocation8 + $0x30] sm:$0xff]  }
 0x1eb   :  { %2427 = vmatmul.mubr.bf16.vlgmr.msra.gmra.mrb[4].mxu0 %v1994_v16  ;;  %3033 = vmatpush3.bf16.msra.mxu1 %v3577_v14  ;;  %v3579_v16 = vld [vmem:[#allocation8 + $0x38] sm:$0xff]  }
 0x1ec   :  { %2436 = vmatpush1.bf16.msra.mxu0 %v3516_v15  ;;  %v3578_v15 = vld [vmem:[#allocation8 + $0x78] sm:$0xff]  }
 0x1ed   :  { %2437 = vmatprep.subr.bf16.mxu0 %v3521_v18  ;;  %3034 = vmatprep.subr.bf16.mxu1 %v3578_v15  ;;  %v2067_v18 = vrot.slane %v2062_v63, %v3820_v62 }
 0x1ef   :  { %3035 = vmatpush3.bf16.msra.mxu1 %v3579_v16 }
 0x1f0   :  { %2438 = vmatpush1.bf16.msra.mxu0 %v3519_v22 }
 0x1f1   :  { %2439 = vmatprep.subr.bf16.mxu0 %v3524_v23 }
 0x1f4   :  { %2440 = vmatpush1.bf16.msra.mxu0 %v3522_v28 }
 0x1f5   :  { %2441 = vmatprep.subr.bf16.mxu0 %v3527_v29 }
 0x1f8   :  { %2442 = vmatpush1.bf16.msra.mxu0 %v3525_v31  ;;  %v2656_v31 = vld [vmem:[%s3860_s7] sm:$0x1] }
 0x1f9   :  { %2443 = vmatprep.subr.bf16.mxu0 %v3530_v32  ;;  %v2657_v17 = vunpack.c.l.bf16 %v2656_v31 }
 0x1fb   :  { %v2661_v35 = vrot.slane %v2657_v17, %v3820_v62 }
 0x1fc   :  { %2444 = vmatpush1.bf16.msra.mxu0 %v3528_v34 }
 0x1fd   :  { %2445 = vmatprep.subr.bf16.mxu0 %v3533_v25 }
 0x200   :  { %2446 = vmatpush1.bf16.msra.mxu0 %v3531_v36 }
 0x201   :  { %2447 = vmatprep.subr.bf16.mxu0 %v3536_v53 }
 0x204   :  { %2448 = vmatpush1.bf16.msra.mxu0 %v3534_v38 }
 0x205   :  { %2449 = vmatprep.subr.bf16.mxu0 %v3539_v39 }
 0x208   :  { %2450 = vmatpush1.bf16.msra.mxu0 %v3537_v40 }
 0x209   :  { %2451 = vmatprep.subr.bf16.mxu0 %v3542_v41 }
 0x20c   :  { %2452 = vmatpush1.bf16.msra.mxu0 %v3540_v42 }
 0x20d   :  { %2453 = vmatprep.subr.bf16.mxu0 %v3545_v43 }
 0x210   :  { %2454 = vmatpush1.bf16.msra.mxu0 %v3543_v44 }
 0x211   :  { %2455 = vmatprep.subr.bf16.mxu0 %v3548_v45 }
 0x214   :  { %2456 = vmatpush1.bf16.msra.mxu0 %v3546_v46 }
 0x215   :  { %2457 = vmatprep.subr.bf16.mxu0 %v3551_v47 }
 0x218   :  { %2458 = vmatpush1.bf16.msra.mxu0 %v3549_v48 }
 0x219   :  { %2459 = vmatprep.subr.bf16.mxu0 %v3554_v49 }
 0x21c   :  { %2460 = vmatpush1.bf16.msra.mxu0 %v3552_v50 }
 0x21d   :  { %2461 = vmatprep.subr.bf16.mxu0 %v3557_v51 }
 0x220   :  { %2462 = vmatpush1.bf16.msra.mxu0 %v3555_v52 }
 0x221   :  { %2463 = vmatprep.subr.bf16.mxu0 %v3560_v54 }
 0x224   :  { %2464 = vmatpush1.bf16.msra.mxu0 %v3558_v55 }
 0x225   :  { %2465 = vmatprep.subr.bf16.mxu0 %v3563_v56 }
 0x228   :  { %2466 = vmatpush1.bf16.msra.mxu0 %v3561_v57 }
 0x261   :  { %v1983_v24 = vpop.f32.mrb[4].mxu1 }
 0x262   :  { %v3046_v2 = vadd.f32 %v1983_v24, %v373_v60  ;;  %v1985_v3 = vpop.f32.mrb[5].mxu1 }
 0x263   :  { %v3047_v4 = vadd.f32 %v1985_v3, %v377_v1  ;;  %v1987_v5 = vpop.f32.mrb[6].mxu1 }
 0x264   :  { %v1992_v6 = vmax.f32 %v3046_v2, 0.0  ;;  %v1988_v7 = vpop.f32.mrb[7].mxu1 }
 0x265   :  { %v1993_v8 = vmax.f32 %v3047_v4, 0.0 }
 0x266   :  { %v1996_v11 = vpack.c.bf16 %v1992_v6, %v1992_v6 }
 0x267   :  { %v1997_v10 = vpack.c.bf16 %v1993_v8, %v1993_v8 }
 0x269   :  { %2467 = vmatprep.mubr.bf16.mxu0 %v1997_v10 }
 0x26a   :  { %2468 = vmatmul.mubr.bf16.vlgmr.msra.gmra.mrb[4].mxu0 %v1996_v11 }
 0x33d   :  { %v2469_v20 = vpop.f32.mrb[4].mxu0 }
 0x33e   :  { %v3048_v21 = vadd.f32 %v2469_v20, %v2067_v18  ;;  %v2471_v22 = vpop.f32.mrb[5].mxu0 }
 0x33f   :  { %v3049_v23 = vadd.f32 %v2471_v22, %v2071_v19  ;;  %v2473_v26 = vpop.f32.mrb[6].mxu0 }
 0x340   :  { %v2476_v27 = vmax.f32 %v3048_v21, 0.0  ;;  %v2474_v28 = vpop.f32.mrb[7].mxu0 }
 0x341   :  { %v2477_v29 = vmax.f32 %v3049_v23, 0.0 }
 0x342   :  { %v2478_v9 = vpack.c.bf16 %v2476_v27, %v2476_v27 }
 0x343   :  { %v2479_v30 = vpack.c.bf16 %v2477_v29, %v2477_v29 }
 0x345   :  { %2647 = vmatprep.mubr.bf16.mxu1 %v2479_v30 }
 0x346   :  { %2648 = vmatmul.mubr.bf16.vlgmr.msra.gmra.mrb[8].mxu1 %v2478_v9 }
 0x419   :  { %v3036_v32 = vpop.f32.mrb[8].mxu1 }
 0x41a   :  { %v3037_v61 = vpop.f32.mrb[9].mxu1 }
 0x41b   :  { %v3038_v33 = vadd.f32 %v3037_v61, %v3036_v32  ;;  %v3039_v34 = vpop.f32.mrb[10].mxu1 }
 0x41c   :  { %v3040_v25 = vpop.f32.mrb[11].mxu1 }
 0x41d   :  { %v2650_v12 = vadd.f32 %v3038_v33, %v3002_v0 }
 0x41f   :  { %v2655_v36 = vmax.f32 %v2650_v12, 0.0 }
 0x421   :  { %v2662_v53 = vmul.f32 %v2661_v35, %v2655_v36 }
 0x423   :  { %2663 = vadd.xlane.f32.xlu0 %v2662_v53 }
 0x4b0   :  { %v2664_v38 = vpop.xlane.xlu0 %2663 }
 0x4b1   :  { %v2672_v39 = vadd.f32 %v3019_v37, %v2664_v38 }
 0x4b3   :  { %2674 = vst.msk [vmem:[%s3862_s9] sm:$0xff] %vm2673_vm0, %v2672_v39 }
 0x4b4   :  { %2679 = vsyncpa [#allocation4], 1 }
 0x4b5   :  { %2680 = vsyncpa [#allocation6], 1 }
 0x4b6   :  { %2681 = vsyncpa [#allocation9], 1 }

</bundles_post_ra>
